<compile_context>
chip_gen: v6e
topology: v6e:2x2x1
jax: 0.10.0
libtpu: 0.0.40
codegen_flags: <defaults>
</compile_context>

<pallas_src>
import jax
import jax.numpy as jnp
from jax.experimental import pallas as pl
from jax.experimental.pallas import tpu as pltpu

LANE = 128


def _round_up(v, m):
    return (v + m - 1) // m * m


def _pick_tk(n_pad):
    for tk in (512, 256, 128):
        if n_pad % tk == 0:
            return tk
    return 128


def _physical_vmem_bytes():
    try:
        info = pltpu.get_tpu_info()
        for attr in ("vmem_capacity_bytes", "vmem_bytes", "vmem_size_bytes"):
            v = getattr(info, attr, None)
            if v:
                return int(v)
    except Exception:
        pass
    return 64 << 20  # conservative (v7x per-core VMEM)


def _required_vmem_bytes(n_pad, f_pad, tk):
    bf16, f32 = 2, 4
    a_scratch   = n_pad * n_pad * bf16            # parked adjacency (layers 2-4)
    h_scratch   = n_pad * f_pad * bf16            # hidden state
    agg_scratch = n_pad * f_pad * f32             # layer-1 aggregation accumulator
    out_buf     = n_pad * f_pad * f32             # resident output block
    a_panels    = 2 * n_pad * tk * bf16           # double-buffered A input panel
    x_panels    = 2 * tk * f_pad * bf16           # double-buffered x input panel
    rdeg        = n_pad * LANE * f32              # (Np,1) padded to a full lane
    weights     = 4 * (2 * f_pad * f_pad * bf16 + 8 * f_pad * f32)
    return (a_scratch + h_scratch + agg_scratch + out_buf +
            a_panels + x_panels + rdeg + weights)


# ---------------------------------------------------------------------------
# Fused Pallas kernel.
#  grid step k (reduction axis over A column panels / x row panels):
#    - park A[:, k] panel and x[k, :] panel into persistent VMEM scratch
#    - accumulate layer-1 aggregation  agg += A_panel @ x_panel  (bf16 MXU, f32)
#  last step:
#    - layer 1: out = (agg * 1/deg) @ W_l + x @ W_r + b ; ReLU ; h = bf16(out)
#    - layers 2..4: agg = (A @ h) * 1/deg ; out = agg@W_l + h@W_r + b ; ReLU(1..3)
#    - write o_ref (f32)
# ---------------------------------------------------------------------------
def _gnn_encoder_kernel(a_ref, x_ref, rdeg_ref, *rest):
    (w1l, w1r, b1, w2l, w2r, b2, w3l, w3r, b3, w4l, w4r, b4,
     o_ref, a_sc, h_sc, agg_sc) = rest

    k = pl.program_id(0)
    n_steps = pl.num_programs(0)
    tk = a_ref.shape[1]

    @pl.when(k == 0)
    def _init():
        agg_sc[...] = jnp.zeros_like(agg_sc)

    a_panel = a_ref[...]          # (Np, TK) bf16 binary adjacency panel
    x_panel = x_ref[...]          # (TK, F_PAD) bf16 node-feature panel

    off = pl.multiple_of(k * tk, tk)
    a_sc[:, pl.ds(off, tk)] = a_panel       # park for layers 2-4
    h_sc[pl.ds(off, tk), :] = x_panel       # park root features (layer-1 h)

    # Layer-1 neighbor aggregation, accumulated panel-by-panel so the MXU work
    # overlaps the A HBM->VMEM DMA of the next panel.
    agg_sc[...] += jnp.dot(a_panel, x_panel, preferred_element_type=jnp.float32)

    @pl.when(k == n_steps - 1)
    def _finalize():
        rdeg = rdeg_ref[...]                 # (Np, 1) f32: 1/in-degree
        a_full = a_sc[...]                   # (Np, Np) bf16
        h = h_sc[...]                        # (Np, F_PAD) bf16
        layers = ((w1l, w1r, b1), (w2l, w2r, b2), (w3l, w3r, b3), (w4l, w4r, b4))

        agg = agg_sc[...] * rdeg             # f32 mean normalization (VPU)
        out = None
        for i, (wl, wr, bb) in enumerate(layers):
            if i > 0:
                agg = jnp.dot(a_full, h, preferred_element_type=jnp.float32) * rdeg
            out = jnp.dot(agg.astype(jnp.bfloat16), wl[...],
                          preferred_element_type=jnp.float32)
            out = out + jnp.dot(h, wr[...], preferred_element_type=jnp.float32)
            out = out + bb[...]
            if i < len(layers) - 1:
                h = jnp.maximum(out, 0.0).astype(jnp.bfloat16)
        o_ref[...] = out                     # no activation after layer 4


def gnn_encoder_forward(x, adj, recip_deg, params_padded, out_channels):
    """Fused forward of the 4-layer GNNEncoder.

    x            : [N, F_in] f32 node features (unpadded)
    adj          : [Np, Np] bf16 binary (edge-count) adjacency, padded
    recip_deg    : [Np, 1] f32 reciprocal in-degree (mean normalization)
    params_padded: 4 tuples (W_l [F,F] bf16, W_r [F,F] bf16, b [1,F] f32)
    """
    n, f_in = x.shape
    n_pad = adj.shape[0]
    f_pad = params_padded[0][0].shape[0]

    tk = _pick_tk(n_pad)
    grid = (n_pad // tk,)

    # Zero-pad node rows / feature cols; bf16 because the MXU consumes bf16
    # operands anyway.  (Padded node rows do pick up the bias after layer 1,
    # but padded A columns are zero so they never leak into real rows, and the
    # final slice drops them.)
    x_pad = jnp.zeros((n_pad, f_pad), jnp.bfloat16)
    x_pad = x_pad.at[:n, :f_in].set(x.astype(jnp.bfloat16))

    flat_params = []
    for wl, wr, b in params_padded:
        flat_params.extend((wl, wr, b))

    in_specs = [
        pl.BlockSpec((n_pad, tk), lambda k: (0, k)),     # A column panels
        pl.BlockSpec((tk, f_pad), lambda k: (k, 0)),     # x row panels
        pl.BlockSpec((n_pad, 1), lambda k: (0, 0)),      # 1/deg (resident)
    ]
    for wl, wr, b in params_padded:
        in_specs += [
            pl.BlockSpec(wl.shape, lambda k: (0, 0)),
            pl.BlockSpec(wr.shape, lambda k: (0, 0)),
            pl.BlockSpec(b.shape, lambda k: (0, 0)),
        ]

    scratch = [
        pltpu.VMEM((n_pad, n_pad), jnp.bfloat16),        # parked adjacency
        pltpu.VMEM((n_pad, f_pad), jnp.bfloat16),        # hidden state
        pltpu.VMEM((n_pad, f_pad), jnp.float32),         # layer-1 agg accumulator
    ]

    # Static VMEM budget check + per-chip scoped-VMEM limit.
    need = _required_vmem_bytes(n_pad, f_pad, tk)
    phys = _physical_vmem_bytes()
    budget = phys - (8 << 20)
    if need > budget:
        # TODO(synk): stream A per layer (pl.ANY + emit_pipeline) for graphs
        # whose dense adjacency does not fit in VMEM.
        raise ValueError(
            f"dense-resident adjacency needs ~{need >> 20} MiB VMEM but only "
            f"~{budget >> 20} MiB is available on this chip")
    vmem_limit = int(min(max(need + (4 << 20), 32 << 20), phys - (2 << 20)))

    out_pad = pl.pallas_call(
        _gnn_encoder_kernel,
        out_shape=jax.ShapeDtypeStruct((n_pad, f_pad), jnp.float32),
        grid=grid,
        in_specs=in_specs,
        out_specs=pl.BlockSpec((n_pad, f_pad), lambda k: (0, 0)),
        scratch_shapes=scratch,
        compiler_params=pltpu.CompilerParams(
            dimension_semantics=("arbitrary",),   # reduction axis
            vmem_limit_bytes=vmem_limit,
        ),
    )(adj, x_pad, recip_deg, *flat_params)

    return out_pad[:n, :out_channels]


# ---------------------------------------------------------------------------
# Graph / parameter preprocessing (done once per graph, outside the forward).
# ---------------------------------------------------------------------------
def build_adjacency(edge_index, num_nodes, n_pad):
    """Binary (edge-count) adjacency A[i, j] = #edges j -> i, padded to
    [n_pad, n_pad] bf16 (exact), plus f32 reciprocal in-degree [n_pad, 1]."""
    src = edge_index[0]
    dst = edge_index[1]
    adj = jnp.zeros((n_pad, n_pad), jnp.float32).at[dst, src].add(1.0)
    deg = jnp.sum(adj, axis=1, keepdims=True)
    recip_deg = 1.0 / jnp.maximum(deg, 1.0)
    return adj.astype(jnp.bfloat16), recip_deg.astype(jnp.float32)


def pad_params(params, f_pad):
    """Zero-pad each layer's W_l / W_r to [f_pad, f_pad] bf16 and bias to
    [1, f_pad] f32."""
    padded = []
    for w_l, w_r, b_l in params:
        f_in, f_out = w_l.shape
        wl = jnp.zeros((f_pad, f_pad), jnp.float32).at[:f_in, :f_out].set(w_l)
        wr = jnp.zeros((f_pad, f_pad), jnp.float32).at[:f_in, :f_out].set(w_r)
        b = jnp.zeros((1, f_pad), jnp.float32).at[:, :f_out].set(b_l)
        padded.append((wl.astype(jnp.bfloat16), wr.astype(jnp.bfloat16), b))
    return padded


def init_params(key, in_channels, hidden_channels, out_channels):
    """Glorot-uniform-ish init for the 4 SAGEConv layers.
    Each layer: W_l (neighbor transform, with bias), W_r (root, no bias)."""
    dims = [
        (in_channels, hidden_channels),
        (hidden_channels, out_channels),
        (out_channels, out_channels),
        (out_channels, out_channels),
    ]
    params = []
    for f_in, f_out in dims:
        key, k1, k2 = jax.random.split(key, 3)
        limit = (6.0 / (f_in + f_out)) ** 0.5
        w_l = jax.random.uniform(k1, (f_in, f_out), jnp.float32, -limit, limit)
        w_r = jax.random.uniform(k2, (f_in, f_out), jnp.float32, -limit, limit)
        b_l = jnp.zeros((1, f_out), jnp.float32)
        params.append((w_l, w_r, b_l))
    return params


def gnn_encoder_reference(x, edge_index, params, num_nodes):
    """Pure-JAX f32 reference (PyG SAGEConv mean-aggr semantics)."""
    src, dst = edge_index[0], edge_index[1]
    adj = jnp.zeros((num_nodes, num_nodes), jnp.float32).at[dst, src].add(1.0)
    deg = jnp.maximum(jnp.sum(adj, axis=1, keepdims=True), 1.0)
    h = x
    for i, (w_l, w_r, b_l) in enumerate(params):
        agg = (adj @ h) / deg
        out = agg @ w_l + h @ w_r + b_l
        if i < len(params) - 1:
            out = jnp.maximum(out, 0.0)
        h = out
    return h


if __name__ == "__main__":
    key = jax.random.PRNGKey(0)

    num_nodes = 32
    num_edges = 64
    in_channels = 16
    hidden_channels = 32
    out_channels = 16

    key, kx, ke_src, ke_dst = jax.random.split(key, 4)
    x = jax.random.normal(kx, (num_nodes, in_channels), jnp.float32)
    edge_index = jnp.stack(
        [
            jax.random.randint(ke_src, (num_edges,), 0, num_nodes),
            jax.random.randint(ke_dst, (num_edges,), 0, num_nodes),
        ],
        axis=0,
    )  # [2, E], row 0 = source, row 1 = target (PyG convention)

    params = init_params(key, in_channels, hidden_channels, out_channels)

    # One-time graph / parameter preprocessing (hoisted out of the forward).
    f_pad = _round_up(max(in_channels, hidden_channels, out_channels), LANE)
    n_pad = _round_up(num_nodes, LANE)
    adj, recip_deg = build_adjacency(edge_index, num_nodes, n_pad)
    params_padded = pad_params(params, f_pad)

    out = gnn_encoder_forward(x, adj, recip_deg, params_padded, out_channels)
    out = jax.block_until_ready(out)

    assert out.shape == (num_nodes, out_channels)
    assert out.dtype == jnp.float32
    assert bool(jnp.all(jnp.isfinite(out)))

    # Loose tolerance: kernel uses bf16 MXU operands with f32 accumulation.
    ref = gnn_encoder_reference(x, edge_index, params, num_nodes)
    max_err = float(jnp.max(jnp.abs(out - ref)))
    scale = float(jnp.max(jnp.abs(ref))) + 1.0
    assert max_err < 0.05 * scale, f"max_err={max_err}, scale={scale}"

    print("KERNEL_OK")
</pallas_src>

<mosaic_0001>
module attributes {stable_mosaic.version = 11 : i64} {
  func.func @_gnn_encoder_kernel(%arg0: i32, %arg1: memref<128x128xbf16, #tpu.memory_space<vmem>>, %arg2: memref<128x128xbf16, #tpu.memory_space<vmem>>, %arg3: memref<128x1xf32, #tpu.memory_space<vmem>>, %arg4: memref<128x128xbf16, #tpu.memory_space<vmem>>, %arg5: memref<128x128xbf16, #tpu.memory_space<vmem>>, %arg6: memref<1x128xf32, #tpu.memory_space<vmem>>, %arg7: memref<128x128xbf16, #tpu.memory_space<vmem>>, %arg8: memref<128x128xbf16, #tpu.memory_space<vmem>>, %arg9: memref<1x128xf32, #tpu.memory_space<vmem>>, %arg10: memref<128x128xbf16, #tpu.memory_space<vmem>>, %arg11: memref<128x128xbf16, #tpu.memory_space<vmem>>, %arg12: memref<1x128xf32, #tpu.memory_space<vmem>>, %arg13: memref<128x128xbf16, #tpu.memory_space<vmem>>, %arg14: memref<128x128xbf16, #tpu.memory_space<vmem>>, %arg15: memref<1x128xf32, #tpu.memory_space<vmem>>, %arg16: memref<128x128xf32, #tpu.memory_space<vmem>>, %arg17: memref<128x128xbf16, #tpu.memory_space<vmem>>, %arg18: memref<128x128xbf16, #tpu.memory_space<vmem>>, %arg19: memref<128x128xf32, #tpu.memory_space<vmem>>) attributes {dimension_semantics = [#tpu.dimension_semantics<arbitrary>], iteration_bounds = array<i64: 1>, scalar_prefetch = 0 : i64, scratch_operands = 3 : i64, tpu.core_type = #tpu.core_type<tc>, window_params = [{transform_indices = @transform_0, window_bounds = array<i64: 128, 128>}, {transform_indices = @transform_1, window_bounds = array<i64: 128, 128>}, {pipeline_mode = #tpu.pipeline_mode<synchronous>, transform_indices = @transform_2, window_bounds = array<i64: 128, 1>}, {pipeline_mode = #tpu.pipeline_mode<synchronous>, transform_indices = @transform_3, window_bounds = array<i64: 128, 128>}, {pipeline_mode = #tpu.pipeline_mode<synchronous>, transform_indices = @transform_4, window_bounds = array<i64: 128, 128>}, {pipeline_mode = #tpu.pipeline_mode<synchronous>, transform_indices = @transform_5, window_bounds = array<i64: 1, 128>}, {pipeline_mode = #tpu.pipeline_mode<synchronous>, transform_indices = @transform_6, window_bounds = array<i64: 128, 128>}, {pipeline_mode = #tpu.pipeline_mode<synchronous>, transform_indices = @transform_7, window_bounds = array<i64: 128, 128>}, {pipeline_mode = #tpu.pipeline_mode<synchronous>, transform_indices = @transform_8, window_bounds = array<i64: 1, 128>}, {pipeline_mode = #tpu.pipeline_mode<synchronous>, transform_indices = @transform_9, window_bounds = array<i64: 128, 128>}, {pipeline_mode = #tpu.pipeline_mode<synchronous>, transform_indices = @transform_10, window_bounds = array<i64: 128, 128>}, {pipeline_mode = #tpu.pipeline_mode<synchronous>, transform_indices = @transform_11, window_bounds = array<i64: 1, 128>}, {pipeline_mode = #tpu.pipeline_mode<synchronous>, transform_indices = @transform_12, window_bounds = array<i64: 128, 128>}, {pipeline_mode = #tpu.pipeline_mode<synchronous>, transform_indices = @transform_13, window_bounds = array<i64: 128, 128>}, {pipeline_mode = #tpu.pipeline_mode<synchronous>, transform_indices = @transform_14, window_bounds = array<i64: 1, 128>}, {pipeline_mode = #tpu.pipeline_mode<synchronous>, transform_indices = @transform_15, window_bounds = array<i64: 128, 128>}]} {
    %c0_i32 = arith.constant 0 : i32
    %0 = arith.cmpi eq, %arg0, %c0_i32 : i32
    %1 = arith.extui %0 : i1 to i32
    %c0_i32_0 = arith.constant 0 : i32
    %2 = arith.cmpi ne, %1, %c0_i32_0 : i32
    scf.if %2 {
      %cst_12 = arith.constant 0.000000e+00 : f32
      %18 = vector.broadcast %cst_12 : f32 to vector<128x128xf32>
      %c0_13 = arith.constant 0 : index
      %c0_14 = arith.constant 0 : index
      %19 = vector.load %arg19[%c0_13, %c0_14] : memref<128x128xf32, #tpu.memory_space<vmem>>, vector<128x128xf32>
      tpu.vector_store %arg19[%c0_13, %c0_14], %18 {strides = array<i32>} : memref<128x128xf32, #tpu.memory_space<vmem>>, vector<128x128xf32>,
    } else {
    }
    %c0 = arith.constant 0 : index
    %c0_1 = arith.constant 0 : index
    %3 = vector.load %arg1[%c0, %c0_1] : memref<128x128xbf16, #tpu.memory_space<vmem>>, vector<128x128xbf16>
    %c0_2 = arith.constant 0 : index
    %c0_3 = arith.constant 0 : index
    %4 = vector.load %arg2[%c0_2, %c0_3] : memref<128x128xbf16, #tpu.memory_space<vmem>>, vector<128x128xbf16>
    %c128_i32 = arith.constant 128 : i32
    %5 = arith.muli %arg0, %c128_i32 : i32
    %6 = tpu.assume_multiple %5, 128 : i32
    %c0_4 = arith.constant 0 : index
    %7 = arith.index_cast %6 : i32 to index
    %8 = vector.load %arg17[%c0_4, %7] : memref<128x128xbf16, #tpu.memory_space<vmem>>, vector<128x128xbf16>
    tpu.vector_store %arg17[%c0_4, %7], %3 {strides = array<i32>} : memref<128x128xbf16, #tpu.memory_space<vmem>>, vector<128x128xbf16>,
    %9 = arith.index_cast %6 : i32 to index
    %c0_5 = arith.constant 0 : index
    %10 = vector.load %arg18[%9, %c0_5] : memref<128x128xbf16, #tpu.memory_space<vmem>>, vector<128x128xbf16>
    tpu.vector_store %arg18[%9, %c0_5], %4 {strides = array<i32>} : memref<128x128xbf16, #tpu.memory_space<vmem>>, vector<128x128xbf16>,
    %c0_6 = arith.constant 0 : index
    %c0_7 = arith.constant 0 : index
    %11 = vector.load %arg19[%c0_6, %c0_7] : memref<128x128xf32, #tpu.memory_space<vmem>>, vector<128x128xf32>
    %cst = arith.constant dense<0.000000e+00> : vector<128x128xf32>
    %12 = tpu.matmul %3, %4, %cst {dimension_numbers = #tpu.dot_dimension_numbers<[1], [0], [0], [1], [0, 0, 1, 1], [], []>} : vector<128x128xbf16>, vector<128x128xbf16>, vector<128x128xf32> -> vector<128x128xf32>
    %13 = arith.addf %11, %12 : vector<128x128xf32>
    %c0_8 = arith.constant 0 : index
    %c0_9 = arith.constant 0 : index
    %14 = vector.load %arg19[%c0_8, %c0_9] : memref<128x128xf32, #tpu.memory_space<vmem>>, vector<128x128xf32>
    tpu.vector_store %arg19[%c0_8, %c0_9], %13 {strides = array<i32>} : memref<128x128xf32, #tpu.memory_space<vmem>>, vector<128x128xf32>,
    %c0_i32_10 = arith.constant 0 : i32
    %15 = arith.cmpi eq, %arg0, %c0_i32_10 : i32
    %16 = arith.extui %15 : i1 to i32
    %c0_i32_11 = arith.constant 0 : i32
    %17 = arith.cmpi ne, %16, %c0_i32_11 : i32
    scf.if %17 {
      %c0_12 = arith.constant 0 : index
      %c0_13 = arith.constant 0 : index
      %18 = vector.load %arg3[%c0_12, %c0_13] : memref<128x1xf32, #tpu.memory_space<vmem>>, vector<128x1xf32>
      %c0_14 = arith.constant 0 : index
      %c0_15 = arith.constant 0 : index
      %19 = vector.load %arg17[%c0_14, %c0_15] : memref<128x128xbf16, #tpu.memory_space<vmem>>, vector<128x128xbf16>
      %c0_16 = arith.constant 0 : index
      %c0_17 = arith.constant 0 : index
      %20 = vector.load %arg18[%c0_16, %c0_17] : memref<128x128xbf16, #tpu.memory_space<vmem>>, vector<128x128xbf16>
      %c0_18 = arith.constant 0 : index
      %c0_19 = arith.constant 0 : index
      %21 = vector.load %arg19[%c0_18, %c0_19] : memref<128x128xf32, #tpu.memory_space<vmem>>, vector<128x128xf32>
      %22 = vector.broadcast %18 : vector<128x1xf32> to vector<128x128xf32>
      %23 = arith.mulf %21, %22 : vector<128x128xf32>
      %24 = arith.truncf %23 : vector<128x128xf32> to vector<128x128xbf16>
      %c0_20 = arith.constant 0 : index
      %c0_21 = arith.constant 0 : index
      %25 = vector.load %arg4[%c0_20, %c0_21] : memref<128x128xbf16, #tpu.memory_space<vmem>>, vector<128x128xbf16>
      %cst_22 = arith.constant dense<0.000000e+00> : vector<128x128xf32>
      %26 = tpu.matmul %24, %25, %cst_22 {dimension_numbers = #tpu.dot_dimension_numbers<[1], [0], [0], [1], [0, 0, 1, 1], [], []>} : vector<128x128xbf16>, vector<128x128xbf16>, vector<128x128xf32> -> vector<128x128xf32>
      %c0_23 = arith.constant 0 : index
      %c0_24 = arith.constant 0 : index
      %27 = vector.load %arg5[%c0_23, %c0_24] : memref<128x128xbf16, #tpu.memory_space<vmem>>, vector<128x128xbf16>
      %cst_25 = arith.constant dense<0.000000e+00> : vector<128x128xf32>
      %28 = tpu.matmul %20, %27, %cst_25 {dimension_numbers = #tpu.dot_dimension_numbers<[1], [0], [0], [1], [0, 0, 1, 1], [], []>} : vector<128x128xbf16>, vector<128x128xbf16>, vector<128x128xf32> -> vector<128x128xf32>
      %29 = arith.addf %26, %28 : vector<128x128xf32>
      %c0_26 = arith.constant 0 : index
      %c0_27 = arith.constant 0 : index
      %30 = vector.load %arg6[%c0_26, %c0_27] : memref<1x128xf32, #tpu.memory_space<vmem>>, vector<1x128xf32>
      %31 = vector.broadcast %30 : vector<1x128xf32> to vector<128x128xf32>
      %32 = arith.addf %29, %31 : vector<128x128xf32>
      %cst_28 = arith.constant 0.000000e+00 : f32
      %33 = vector.broadcast %cst_28 : f32 to vector<128x128xf32>
      %34 = arith.maximumf %32, %33 : vector<128x128xf32>
      %35 = arith.truncf %34 : vector<128x128xf32> to vector<128x128xbf16>
      %cst_29 = arith.constant dense<0.000000e+00> : vector<128x128xf32>
      %36 = tpu.matmul %19, %35, %cst_29 {dimension_numbers = #tpu.dot_dimension_numbers<[1], [0], [0], [1], [0, 0, 1, 1], [], []>} : vector<128x128xbf16>, vector<128x128xbf16>, vector<128x128xf32> -> vector<128x128xf32>
      %37 = vector.broadcast %18 : vector<128x1xf32> to vector<128x128xf32>
      %38 = arith.mulf %36, %37 : vector<128x128xf32>
      %39 = arith.truncf %38 : vector<128x128xf32> to vector<128x128xbf16>
      %c0_30 = arith.constant 0 : index
      %c0_31 = arith.constant 0 : index
      %40 = vector.load %arg7[%c0_30, %c0_31] : memref<128x128xbf16, #tpu.memory_space<vmem>>, vector<128x128xbf16>
      %cst_32 = arith.constant dense<0.000000e+00> : vector<128x128xf32>
      %41 = tpu.matmul %39, %40, %cst_32 {dimension_numbers = #tpu.dot_dimension_numbers<[1], [0], [0], [1], [0, 0, 1, 1], [], []>} : vector<128x128xbf16>, vector<128x128xbf16>, vector<128x128xf32> -> vector<128x128xf32>
      %c0_33 = arith.constant 0 : index
      %c0_34 = arith.constant 0 : index
      %42 = vector.load %arg8[%c0_33, %c0_34] : memref<128x128xbf16, #tpu.memory_space<vmem>>, vector<128x128xbf16>
      %cst_35 = arith.constant dense<0.000000e+00> : vector<128x128xf32>
      %43 = tpu.matmul %35, %42, %cst_35 {dimension_numbers = #tpu.dot_dimension_numbers<[1], [0], [0], [1], [0, 0, 1, 1], [], []>} : vector<128x128xbf16>, vector<128x128xbf16>, vector<128x128xf32> -> vector<128x128xf32>
      %44 = arith.addf %41, %43 : vector<128x128xf32>
      %c0_36 = arith.constant 0 : index
      %c0_37 = arith.constant 0 : index
      %45 = vector.load %arg9[%c0_36, %c0_37] : memref<1x128xf32, #tpu.memory_space<vmem>>, vector<1x128xf32>
      %46 = vector.broadcast %45 : vector<1x128xf32> to vector<128x128xf32>
      %47 = arith.addf %44, %46 : vector<128x128xf32>
      %cst_38 = arith.constant 0.000000e+00 : f32
      %48 = vector.broadcast %cst_38 : f32 to vector<128x128xf32>
      %49 = arith.maximumf %47, %48 : vector<128x128xf32>
      %50 = arith.truncf %49 : vector<128x128xf32> to vector<128x128xbf16>
      %cst_39 = arith.constant dense<0.000000e+00> : vector<128x128xf32>
      %51 = tpu.matmul %19, %50, %cst_39 {dimension_numbers = #tpu.dot_dimension_numbers<[1], [0], [0], [1], [0, 0, 1, 1], [], []>} : vector<128x128xbf16>, vector<128x128xbf16>, vector<128x128xf32> -> vector<128x128xf32>
      %52 = vector.broadcast %18 : vector<128x1xf32> to vector<128x128xf32>
      %53 = arith.mulf %51, %52 : vector<128x128xf32>
      %54 = arith.truncf %53 : vector<128x128xf32> to vector<128x128xbf16>
      %c0_40 = arith.constant 0 : index
      %c0_41 = arith.constant 0 : index
      %55 = vector.load %arg10[%c0_40, %c0_41] : memref<128x128xbf16, #tpu.memory_space<vmem>>, vector<128x128xbf16>
      %cst_42 = arith.constant dense<0.000000e+00> : vector<128x128xf32>
      %56 = tpu.matmul %54, %55, %cst_42 {dimension_numbers = #tpu.dot_dimension_numbers<[1], [0], [0], [1], [0, 0, 1, 1], [], []>} : vector<128x128xbf16>, vector<128x128xbf16>, vector<128x128xf32> -> vector<128x128xf32>
      %c0_43 = arith.constant 0 : index
      %c0_44 = arith.constant 0 : index
      %57 = vector.load %arg11[%c0_43, %c0_44] : memref<128x128xbf16, #tpu.memory_space<vmem>>, vector<128x128xbf16>
      %cst_45 = arith.constant dense<0.000000e+00> : vector<128x128xf32>
      %58 = tpu.matmul %50, %57, %cst_45 {dimension_numbers = #tpu.dot_dimension_numbers<[1], [0], [0], [1], [0, 0, 1, 1], [], []>} : vector<128x128xbf16>, vector<128x128xbf16>, vector<128x128xf32> -> vector<128x128xf32>
      %59 = arith.addf %56, %58 : vector<128x128xf32>
      %c0_46 = arith.constant 0 : index
      %c0_47 = arith.constant 0 : index
      %60 = vector.load %arg12[%c0_46, %c0_47] : memref<1x128xf32, #tpu.memory_space<vmem>>, vector<1x128xf32>
      %61 = vector.broadcast %60 : vector<1x128xf32> to vector<128x128xf32>
      %62 = arith.addf %59, %61 : vector<128x128xf32>
      %cst_48 = arith.constant 0.000000e+00 : f32
      %63 = vector.broadcast %cst_48 : f32 to vector<128x128xf32>
      %64 = arith.maximumf %62, %63 : vector<128x128xf32>
      %65 = arith.truncf %64 : vector<128x128xf32> to vector<128x128xbf16>
      %cst_49 = arith.constant dense<0.000000e+00> : vector<128x128xf32>
      %66 = tpu.matmul %19, %65, %cst_49 {dimension_numbers = #tpu.dot_dimension_numbers<[1], [0], [0], [1], [0, 0, 1, 1], [], []>} : vector<128x128xbf16>, vector<128x128xbf16>, vector<128x128xf32> -> vector<128x128xf32>
      %67 = vector.broadcast %18 : vector<128x1xf32> to vector<128x128xf32>
      %68 = arith.mulf %66, %67 : vector<128x128xf32>
      %69 = arith.truncf %68 : vector<128x128xf32> to vector<128x128xbf16>
      %c0_50 = arith.constant 0 : index
      %c0_51 = arith.constant 0 : index
      %70 = vector.load %arg13[%c0_50, %c0_51] : memref<128x128xbf16, #tpu.memory_space<vmem>>, vector<128x128xbf16>
      %cst_52 = arith.constant dense<0.000000e+00> : vector<128x128xf32>
      %71 = tpu.matmul %69, %70, %cst_52 {dimension_numbers = #tpu.dot_dimension_numbers<[1], [0], [0], [1], [0, 0, 1, 1], [], []>} : vector<128x128xbf16>, vector<128x128xbf16>, vector<128x128xf32> -> vector<128x128xf32>
      %c0_53 = arith.constant 0 : index
      %c0_54 = arith.constant 0 : index
      %72 = vector.load %arg14[%c0_53, %c0_54] : memref<128x128xbf16, #tpu.memory_space<vmem>>, vector<128x128xbf16>
      %cst_55 = arith.constant dense<0.000000e+00> : vector<128x128xf32>
      %73 = tpu.matmul %65, %72, %cst_55 {dimension_numbers = #tpu.dot_dimension_numbers<[1], [0], [0], [1], [0, 0, 1, 1], [], []>} : vector<128x128xbf16>, vector<128x128xbf16>, vector<128x128xf32> -> vector<128x128xf32>
      %74 = arith.addf %71, %73 : vector<128x128xf32>
      %c0_56 = arith.constant 0 : index
      %c0_57 = arith.constant 0 : index
      %75 = vector.load %arg15[%c0_56, %c0_57] : memref<1x128xf32, #tpu.memory_space<vmem>>, vector<1x128xf32>
      %76 = vector.broadcast %75 : vector<1x128xf32> to vector<128x128xf32>
      %77 = arith.addf %74, %76 : vector<128x128xf32>
      %c0_58 = arith.constant 0 : index
      %c0_59 = arith.constant 0 : index
      %78 = vector.load %arg16[%c0_58, %c0_59] : memref<128x128xf32, #tpu.memory_space<vmem>>, vector<128x128xf32>
      tpu.vector_store %arg16[%c0_58, %c0_59], %77 {strides = array<i32>} : memref<128x128xf32, #tpu.memory_space<vmem>>, vector<128x128xf32>,
    } else {
    }
    return
  }
  func.func @transform_0(%arg0: i32) -> (i32, i32) {
    %c0_i32 = arith.constant 0 : i32
    %c0_i32_0 = arith.constant 0 : i32
    return %c0_i32, %arg0 : i32, i32
  }
  func.func @transform_1(%arg0: i32) -> (i32, i32) {
    %c0_i32 = arith.constant 0 : i32
    %c0_i32_0 = arith.constant 0 : i32
    return %arg0, %c0_i32 : i32, i32
  }
  func.func @transform_2(%arg0: i32) -> (i32, i32) {
    %c0_i32 = arith.constant 0 : i32
    %c0_i32_0 = arith.constant 0 : i32
    %c0_i32_1 = arith.constant 0 : i32
    return %c0_i32, %c0_i32_0 : i32, i32
  }
  func.func @transform_3(%arg0: i32) -> (i32, i32) {
    %c0_i32 = arith.constant 0 : i32
    %c0_i32_0 = arith.constant 0 : i32
    %c0_i32_1 = arith.constant 0 : i32
    return %c0_i32, %c0_i32_0 : i32, i32
  }
  func.func @transform_4(%arg0: i32) -> (i32, i32) {
    %c0_i32 = arith.constant 0 : i32
    %c0_i32_0 = arith.constant 0 : i32
    %c0_i32_1 = arith.constant 0 : i32
    return %c0_i32, %c0_i32_0 : i32, i32
  }
  func.func @transform_5(%arg0: i32) -> (i32, i32) {
    %c0_i32 = arith.constant 0 : i32
    %c0_i32_0 = arith.constant 0 : i32
    %c0_i32_1 = arith.constant 0 : i32
    return %c0_i32, %c0_i32_0 : i32, i32
  }
  func.func @transform_6(%arg0: i32) -> (i32, i32) {
    %c0_i32 = arith.constant 0 : i32
    %c0_i32_0 = arith.constant 0 : i32
    %c0_i32_1 = arith.constant 0 : i32
    return %c0_i32, %c0_i32_0 : i32, i32
  }
  func.func @transform_7(%arg0: i32) -> (i32, i32) {
    %c0_i32 = arith.constant 0 : i32
    %c0_i32_0 = arith.constant 0 : i32
    %c0_i32_1 = arith.constant 0 : i32
    return %c0_i32, %c0_i32_0 : i32, i32
  }
  func.func @transform_8(%arg0: i32) -> (i32, i32) {
    %c0_i32 = arith.constant 0 : i32
    %c0_i32_0 = arith.constant 0 : i32
    %c0_i32_1 = arith.constant 0 : i32
    return %c0_i32, %c0_i32_0 : i32, i32
  }
  func.func @transform_9(%arg0: i32) -> (i32, i32) {
    %c0_i32 = arith.constant 0 : i32
    %c0_i32_0 = arith.constant 0 : i32
    %c0_i32_1 = arith.constant 0 : i32
    return %c0_i32, %c0_i32_0 : i32, i32
  }
  func.func @transform_10(%arg0: i32) -> (i32, i32) {
    %c0_i32 = arith.constant 0 : i32
    %c0_i32_0 = arith.constant 0 : i32
    %c0_i32_1 = arith.constant 0 : i32
    return %c0_i32, %c0_i32_0 : i32, i32
  }
  func.func @transform_11(%arg0: i32) -> (i32, i32) {
    %c0_i32 = arith.constant 0 : i32
    %c0_i32_0 = arith.constant 0 : i32
    %c0_i32_1 = arith.constant 0 : i32
    return %c0_i32, %c0_i32_0 : i32, i32
  }
  func.func @transform_12(%arg0: i32) -> (i32, i32) {
    %c0_i32 = arith.constant 0 : i32
    %c0_i32_0 = arith.constant 0 : i32
    %c0_i32_1 = arith.constant 0 : i32
    return %c0_i32, %c0_i32_0 : i32, i32
  }
  func.func @transform_13(%arg0: i32) -> (i32, i32) {
    %c0_i32 = arith.constant 0 : i32
    %c0_i32_0 = arith.constant 0 : i32
    %c0_i32_1 = arith.constant 0 : i32
    return %c0_i32, %c0_i32_0 : i32, i32
  }
  func.func @transform_14(%arg0: i32) -> (i32, i32) {
    %c0_i32 = arith.constant 0 : i32
    %c0_i32_0 = arith.constant 0 : i32
    %c0_i32_1 = arith.constant 0 : i32
    return %c0_i32, %c0_i32_0 : i32, i32
  }
  func.func @transform_15(%arg0: i32) -> (i32, i32) {
    %c0_i32 = arith.constant 0 : i32
    %c0_i32_0 = arith.constant 0 : i32
    %c0_i32_1 = arith.constant 0 : i32
    return %c0_i32, %c0_i32_0 : i32, i32
  }
}

</mosaic_0001>

<bundles_post_ra>
// kernel: tpu_custom_call.1
= control target key start
LH: loop header
LB: loop body
LE: loop exit
PB: predicated region body
PF: predicated region fallthrough
CT: control target
= control target key end

     0   :  { %20 = vsyncpa [#allocation6], 0  ;;  %s4221_s0 = inlined_call_operand.vmem [shape: bf16[128,128], index: 0, kind: input, shape index: {}]   ;;  %s4222_s1 = inlined_call_operand.vmem [shape: bf16[128,128], index: 1, kind: input, shape index: {}]   ;;  %s4223_s2 = inlined_call_operand.vmem [shape: f32[128,1], index: 2, kind: input, shape index: {}]   ;;  %s4224_s3 = inlined_call_operand.hbm [shape: bf16[128,128], index: 3, kind: input, shape index: {}]   ;;  %s4225_s4 = inlined_call_operand.hbm [shape: bf16[128,128], index: 4, kind: input, shape index: {}]   ;;  %s4226_s5 = inlined_call_operand.vmem [shape: f32[1,128], index: 5, kind: input, shape index: {}]   ;;  %s4227_s6 = inlined_call_operand.hbm [shape: bf16[128,128], index: 6, kind: input, shape index: {}]   ;;  %s4228_s7 = inlined_call_operand.hbm [shape: bf16[128,128], index: 7, kind: input, shape index: {}]   ;;  %s4229_s8 = inlined_call_operand.vmem [shape: f32[1,128], index: 8, kind: input, shape index: {}]   ;;  %s4230_s9 = inlined_call_operand.hbm [shape: bf16[128,128], index: 9, kind: input, shape index: {}]   ;;  %s4231_s10 = inlined_call_operand.hbm [shape: bf16[128,128], index: 10, kind: input, shape index: {}]   ;;  %s4232_s11 = inlined_call_operand.vmem [shape: f32[1,128], index: 11, kind: input, shape index: {}]   ;;  %s4233_s12 = inlined_call_operand.hbm [shape: bf16[128,128], index: 12, kind: input, shape index: {}]   ;;  %s4234_s13 = inlined_call_operand.hbm [shape: bf16[128,128], index: 13, kind: input, shape index: {}]   ;;  %s4235_s14 = inlined_call_operand.vmem [shape: f32[1,128], index: 14, kind: input, shape index: {}]   ;;  %s4236_s15 = inlined_call_operand.hbm [shape: f32[128,128], index: 15, kind: output, shape index: {}]  }
   0x1   :  { %21 = vsyncpa [#allocation9], 0 }
   0x2   :  { %22 = vsyncpa [#allocation12], 0 }
   0x3   :  { %23 = vsyncpa [#allocation15], 0 }
   0x4   :  { %24 = vsyncpa [#allocation18], 0 }
   0x5   :  { %25 = vsyncpa [#allocation7], 0  ;;  %s3598_s18 = smov [#allocation8]   ;;  %s3599_s20 = smov [#allocation11]  }
   0x6   :  { %s49_s19 = sshll.u32 %s3598_s18, 4  ;;  %s75_s21 = sshll.u32 %s3599_s20, 4  ;;  %s50_s19 = int_to_ptr.vmem [resolvable:$true] %s49_s19  ;;  %s76_s21 = int_to_ptr.vmem [resolvable:$true] %s75_s21 }
   0x7   :  { %s3414_s22 = scalar_lea.vmem %s50_s19, 1024  ;;  %p3419_p1 = scmp.lt.s32.totalorder %s50_s19, %s50_s19 }
   0x8   :  { %p3415_p0 = scmp.ne.s32.totalorder %s50_s19, %s3414_s22  ;;  %p3420_p2 = scmp.lt.s32.totalorder %s3414_s22, %s3414_s22 }
   0xa   :  { %p3421_p3 = por %p3420_p2, %p3419_p1 }
   0xc   :  { %p3422_p4 = pnand %p3421_p3, %p3415_p0 }
   0xe   :  { %3425 = shalt.err (!%p3422_p4)
}
   0xf   :  { %s3600_s23 = smov 64   ;;  %s3601_s24 = smov 4  }
  0x10   :  { %55 = dma.hbm_to_vmem [thread:$0]  %s4225_s4, 1024, %s50_s19, [#allocation9], %s3600_s23, %s3600_s23, %s3601_s24  }
  0x11   :  { %s3434_s27 = scalar_lea.vmem %s76_s21, 1024  ;;  %p3439_p6 = scmp.lt.s32.totalorder %s76_s21, %s76_s21 }
  0x12   :  { %p3435_p5 = scmp.ne.s32.totalorder %s76_s21, %s3434_s27  ;;  %p3440_p7 = scmp.lt.s32.totalorder %s3434_s27, %s3434_s27 }
  0x14   :  { %p3441_p8 = por %p3440_p7, %p3439_p6 }
  0x16   :  { %p3442_p9 = pnand %p3441_p8, %p3435_p5 }
  0x18   :  { %3445 = shalt.err (!%p3442_p9)
}
  0x19   :  { %81 = dma.hbm_to_vmem [thread:$0]  %s4228_s7, 1024, %s76_s21, [#allocation12], %s3600_s23, %s3600_s23, %s3601_s24  }
  0x1a   :  { %s3602_s30 = smov [#allocation14]   ;;  %s3603_s17 = smov [#allocation5]  }
  0x1b   :  { %s101_s16 = sshll.u32 %s3602_s30, 4  ;;  %s37_s18 = sshll.u32 %s3603_s17, 4  ;;  %s102_s16 = int_to_ptr.vmem [resolvable:$true] %s101_s16  ;;  %s38_s18 = int_to_ptr.vmem [resolvable:$true] %s37_s18 }
  0x1c   :  { %s3454_s4 = scalar_lea.vmem %s102_s16, 1024  ;;  %p3459_p11 = scmp.lt.s32.totalorder %s102_s16, %s102_s16 }
  0x1d   :  { %p3455_p10 = scmp.ne.s32.totalorder %s102_s16, %s3454_s4  ;;  %p3460_p12 = scmp.lt.s32.totalorder %s3454_s4, %s3454_s4 }
  0x1f   :  { %p3461_p13 = por %p3460_p12, %p3459_p11 }
  0x21   :  { %p3462_p0 = pnand %p3461_p13, %p3455_p10 }
  0x23   :  { %3465 = shalt.err (!%p3462_p0)
}
  0x24   :  { %107 = dma.hbm_to_vmem [thread:$0]  %s4231_s10, 1024, %s102_s16, [#allocation15], %s3600_s23, %s3600_s23, %s3601_s24  }
  0x25   :  { %s3474_s7 = scalar_lea.vmem %s38_s18, 1024  ;;  %p3479_p2 = scmp.lt.s32.totalorder %s38_s18, %s38_s18 }
  0x26   :  { %p3475_p1 = scmp.ne.s32.totalorder %s38_s18, %s3474_s7  ;;  %p3480_p3 = scmp.lt.s32.totalorder %s3474_s7, %s3474_s7 }
  0x28   :  { %p3481_p4 = por %p3480_p3, %p3479_p2 }
  0x2a   :  { %p3482_p5 = pnand %p3481_p4, %p3475_p1 }
  0x2c   :  { %3485 = shalt.err (!%p3482_p5)
}
  0x2d   :  { %43 = dma.hbm_to_vmem [thread:$0]  %s4224_s3, 1024, %s38_s18, [#allocation6], %s3600_s23, %s3600_s23, %s3601_s24  }
  0x2e   :  { %s3604_s25 = smov [#allocation10]   ;;  %s3605_s27 = smov [#allocation13]  }
  0x2f   :  { %s63_s26 = sshll.u32 %s3604_s25, 4  ;;  %s89_s28 = sshll.u32 %s3605_s27, 4  ;;  %s64_s26 = int_to_ptr.vmem [resolvable:$true] %s63_s26  ;;  %s90_s28 = int_to_ptr.vmem [resolvable:$true] %s89_s28 }
  0x30   :  { %s3494_s10 = scalar_lea.vmem %s64_s26, 1024  ;;  %p3499_p7 = scmp.lt.s32.totalorder %s64_s26, %s64_s26 }
  0x31   :  { %p3495_p6 = scmp.ne.s32.totalorder %s64_s26, %s3494_s10  ;;  %p3500_p8 = scmp.lt.s32.totalorder %s3494_s10, %s3494_s10 }
  0x33   :  { %p3501_p9 = por %p3500_p8, %p3499_p7 }
  0x35   :  { %p3502_p10 = pnand %p3501_p9, %p3495_p6 }
  0x37   :  { %3505 = shalt.err (!%p3502_p10)
}
  0x38   :  { %69 = dma.hbm_to_vmem [thread:$0]  %s4227_s6, 1024, %s64_s26, [#allocation9], %s3600_s23, %s3600_s23, %s3601_s24  }
  0x39   :  { %s3514_s3 = scalar_lea.vmem %s90_s28, 1024  ;;  %p3519_p12 = scmp.lt.s32.totalorder %s90_s28, %s90_s28 }
  0x3a   :  { %p3515_p11 = scmp.ne.s32.totalorder %s90_s28, %s3514_s3  ;;  %p3520_p13 = scmp.lt.s32.totalorder %s3514_s3, %s3514_s3 }
  0x3c   :  { %p3521_p0 = por %p3520_p13, %p3519_p12 }
  0x3e   :  { %p3522_p1 = pnand %p3521_p0, %p3515_p11 }
  0x40   :  { %3525 = shalt.err (!%p3522_p1)
}
  0x41   :  { %95 = dma.hbm_to_vmem [thread:$0]  %s4230_s9, 1024, %s90_s28, [#allocation12], %s3600_s23, %s3600_s23, %s3601_s24  }
  0x42   :  { %s3606_s18 = smov [#allocation16]   ;;  %s3607_s19 = smov [#allocation17]  }
  0x43   :  { %s115_s4 = sshll.u32 %s3606_s18, 4  ;;  %s127_s20 = sshll.u32 %s3607_s19, 4  ;;  %s116_s4 = int_to_ptr.vmem [resolvable:$true] %s115_s4  ;;  %s128_s20 = int_to_ptr.vmem [resolvable:$true] %s127_s20 }
  0x44   :  { %s3534_s6 = scalar_lea.vmem %s116_s4, 1024  ;;  %p3539_p3 = scmp.lt.s32.totalorder %s116_s4, %s116_s4 }
  0x45   :  { %p3535_p2 = scmp.ne.s32.totalorder %s116_s4, %s3534_s6  ;;  %p3540_p4 = scmp.lt.s32.totalorder %s3534_s6, %s3534_s6 }
  0x47   :  { %p3541_p5 = por %p3540_p4, %p3539_p3 }
  0x49   :  { %p3542_p6 = pnand %p3541_p5, %p3535_p2 }
  0x4b   :  { %3545 = shalt.err (!%p3542_p6)
}
  0x4c   :  { %121 = dma.hbm_to_vmem [thread:$0]  %s4233_s12, 1024, %s116_s4, [#allocation15], %s3600_s23, %s3600_s23, %s3601_s24  }
  0x4d   :  { %s3554_s9 = scalar_lea.vmem %s128_s20, 1024  ;;  %p3559_p8 = scmp.lt.s32.totalorder %s128_s20, %s128_s20 }
  0x4e   :  { %p3555_p7 = scmp.ne.s32.totalorder %s128_s20, %s3554_s9  ;;  %p3560_p9 = scmp.lt.s32.totalorder %s3554_s9, %s3554_s9 }
  0x50   :  { %p3561_p10 = por %p3560_p9, %p3559_p8 }
  0x52   :  { %p3562_p11 = pnand %p3561_p10, %p3555_p7 }
  0x54   :  { %3565 = shalt.err (!%p3562_p11)
}
  0x55   :  { %133 = dma.hbm_to_vmem [thread:$0]  %s4234_s13, 1024, %s128_s20, [#allocation18], %s3600_s23, %s3600_s23, %s3601_s24  }
  0x56   :  { %3586 = dma.done.wait [#allocation6], 1024  }
  0x57   :  { %3587 = vsyncadd [#allocation6], 4294966272 }
  0x58   :  { %3588 = dma.done.wait [#allocation9], 2048  }
  0x59   :  { %3589 = vsyncadd [#allocation9], 4294965248 }
  0x5a   :  { %3590 = dma.done.wait [#allocation12], 2048  }
  0x5b   :  { %3591 = vsyncadd [#allocation12], 4294965248 }
  0x5c   :  { %3592 = dma.done.wait [#allocation15], 2048  }
  0x5d   :  { %3593 = vsyncadd [#allocation15], 4294965248 }
  0x5e   :  { %3594 = dma.done.wait [#allocation18], 1024  }
  0x5f   :  { %3595 = vsyncadd [#allocation18], 4294966272  ;;  %v3608_v0 = vmov 0   ;;  %v211_v1 = vld [vmem:[%s4222_s1 + $0x38] sm:$0xf]  ;;  %v498_v38 = vld [vmem:[%s4223_s2] sm:$0xff] }
  0x60   :  { %3308 = vset.pattern.permute.xlu0 %v3608_v0  ;;  %3309 = vset.pattern.permute.xlu1 %v3608_v0  ;;  %v212_v2 = vld [vmem:[%s4222_s1 + $0x3c] sm:$0xf]  ;;  %v209_v3 = vld [vmem:[%s4222_s1 + $0x30] sm:$0xf]  ;;  %252 = vst [vmem:[#allocation3 + $0x38] sm:$0xf] %v211_v1 }
  0x61   :  { %253 = vst [vmem:[#allocation3 + $0x3c] sm:$0xf] %v212_v2  ;;  %v2633_v4 = vcombine.low %v211_v1, %v212_v2  ;;  %v210_v5 = vld [vmem:[%s4222_s1 + $0x34] sm:$0xf]  ;;  %250 = vst [vmem:[#allocation3 + $0x30] sm:$0xf] %v209_v3  ;;  %564 = vperm.xlu0 %3308, %v498_v38  }
  0x62   :  { %v207_v6 = vld [vmem:[%s4222_s1 + $0x28] sm:$0xf]  ;;  %v208_v7 = vld [vmem:[%s4222_s1 + $0x2c] sm:$0xf]  ;;  %251 = vst [vmem:[#allocation3 + $0x34] sm:$0xf] %v210_v5  ;;  %v2632_v8 = vcombine.low %v209_v3, %v210_v5 }
  0x63   :  { %248 = vst [vmem:[#allocation3 + $0x28] sm:$0xf] %v207_v6  ;;  %249 = vst [vmem:[#allocation3 + $0x2c] sm:$0xf] %v208_v7  ;;  %v205_v9 = vld [vmem:[%s4222_s1 + $0x20] sm:$0xf]  ;;  %2910 = vmatprep.subr.bf16.mxu0 %v2633_v4  ;;  %v2631_v18 = vcombine.low %v207_v6, %v208_v7 }
  0x64   :  { %v206_v10 = vld [vmem:[%s4222_s1 + $0x24] sm:$0xf]  ;;  %v3767_v11 = vld [vmem:[%s4222_s1 + $0x18] sm:$0xf]  ;;  %246 = vst [vmem:[#allocation3 + $0x20] sm:$0xf] %v205_v9  ;;  %2911 = vmatpush3.bf16.msra.mxu0 %v2633_v4 }
  0x65   :  { %247 = vst [vmem:[#allocation3 + $0x24] sm:$0xf] %v206_v10  ;;  %v204_v12 = vld [vmem:[%s4222_s1 + $0x1c] sm:$0xf]  ;;  %244 = vst [vmem:[#allocation3 + $0x18] sm:$0xf] %v3767_v11  ;;  %2912 = vmatprep.subr.bf16.mxu0 %v2632_v8  ;;  %v2630_v32 = vcombine.low %v205_v9, %v206_v10 }
  0x66   :  { %v3776_v13 = vld [vmem:[%s4222_s1 + $0x10] sm:$0xf]  ;;  %v3781_v14 = vld [vmem:[%s4222_s1 + $0x14] sm:$0xf]  ;;  %245 = vst [vmem:[#allocation3 + $0x1c] sm:$0xf] %v204_v12  ;;  %v2629_v41 = vcombine.low %v3767_v11, %v204_v12 }
  0x67   :  { %242 = vst [vmem:[#allocation3 + $0x10] sm:$0xf] %v3776_v13  ;;  %243 = vst [vmem:[#allocation3 + $0x14] sm:$0xf] %v3781_v14  ;;  %v3788_v15 = vld [vmem:[%s4222_s1 + $0x8] sm:$0xf]  ;;  %v2628_v46 = vcombine.low %v3776_v13, %v3781_v14 }
  0x68   :  { %v3793_v16 = vld [vmem:[%s4222_s1 + $0xc] sm:$0xf]  ;;  %v3798_v17 = vld [vmem:[%s4222_s1] sm:$0xf]  ;;  %240 = vst [vmem:[#allocation3 + $0x8] sm:$0xf] %v3788_v15  ;;  %2913 = vmatpush3.bf16.msra.mxu0 %v2632_v8 }
  0x69   :  { %241 = vst [vmem:[#allocation3 + $0xc] sm:$0xf] %v3793_v16  ;;  %v3805_v19 = vld [vmem:[%s4222_s1 + $0x4] sm:$0xf]  ;;  %238 = vst [vmem:[#allocation3] sm:$0xf] %v3798_v17  ;;  %2914 = vmatprep.subr.bf16.mxu0 %v2631_v18  ;;  %v2627_v50 = vcombine.low %v3788_v15, %v3793_v16 }
  0x6a   :  { %v181_v20 = vld [vmem:[%s4221_s0] sm:$0xf]  ;;  %v182_v21 = vld [vmem:[%s4221_s0 + $0x4] sm:$0xf]  ;;  %239 = vst [vmem:[#allocation3 + $0x4] sm:$0xf] %v3805_v19  ;;  %v2626_v54 = vcombine.low %v3798_v17, %v3805_v19 }
  0x6b   :  { %218 = vst [vmem:[#allocation2] sm:$0xf] %v181_v20  ;;  %219 = vst [vmem:[#allocation2 + $0x4] sm:$0xf] %v182_v21  ;;  %v2618_v22 = vcombine.low %v181_v20, %v182_v21  ;;  %v3818_v23 = vld [vmem:[%s4221_s0 + $0x8] sm:$0xf] }
  0x6c   :  { %v3823_v24 = vld [vmem:[%s4221_s0 + $0xc] sm:$0xf]  ;;  %v3828_v25 = vld [vmem:[%s4221_s0 + $0x10] sm:$0xf]  ;;  %220 = vst [vmem:[#allocation2 + $0x8] sm:$0xf] %v3818_v23  ;;  %2915 = vmatpush3.bf16.msra.mxu0 %v2631_v18 }
  0x6d   :  { %221 = vst [vmem:[#allocation2 + $0xc] sm:$0xf] %v3823_v24  ;;  %v3835_v26 = vld [vmem:[%s4221_s0 + $0x14] sm:$0xf]  ;;  %222 = vst [vmem:[#allocation2 + $0x10] sm:$0xf] %v3828_v25  ;;  %2926 = vmatprep.mubr.bf16.mxu0 %v2618_v22  ;;  %2916 = vmatprep.subr.bf16.mxu0 %v2630_v32  ;;  %v2619_v61 = vcombine.low %v3818_v23, %v3823_v24 }
  0x6e   :  { %v3841_v27 = vld [vmem:[%s4221_s0 + $0x18] sm:$0xf]  ;;  %v3846_v28 = vld [vmem:[%s4221_s0 + $0x1c] sm:$0xf]  ;;  %223 = vst [vmem:[#allocation2 + $0x14] sm:$0xf] %v3835_v26  ;;  %v2620_v63 = vcombine.low %v3828_v25, %v3835_v26 }
  0x6f   :  { %224 = vst [vmem:[#allocation2 + $0x18] sm:$0xf] %v3841_v27  ;;  %225 = vst [vmem:[#allocation2 + $0x1c] sm:$0xf] %v3846_v28  ;;  %v3854_v29 = vld [vmem:[%s4221_s0 + $0x20] sm:$0xf]  ;;  %v2621_v6 = vcombine.low %v3841_v27, %v3846_v28 }
  0x70   :  { %v3859_v30 = vld [vmem:[%s4221_s0 + $0x24] sm:$0xf]  ;;  %v3864_v31 = vld [vmem:[%s4221_s0 + $0x28] sm:$0xf]  ;;  %226 = vst [vmem:[#allocation2 + $0x20] sm:$0xf] %v3854_v29  ;;  %2917 = vmatpush3.bf16.msra.mxu0 %v2630_v32 }
  0x71   :  { %227 = vst [vmem:[#allocation2 + $0x24] sm:$0xf] %v3859_v30  ;;  %v3871_v33 = vld [vmem:[%s4221_s0 + $0x2c] sm:$0xf]  ;;  %228 = vst [vmem:[#allocation2 + $0x28] sm:$0xf] %v3864_v31  ;;  %2918 = vmatprep.subr.bf16.mxu0 %v2629_v41  ;;  %v2622_v7 = vcombine.low %v3854_v29, %v3859_v30 }
  0x72   :  { %v3877_v34 = vld [vmem:[%s4221_s0 + $0x30] sm:$0xf]  ;;  %v3882_v35 = vld [vmem:[%s4221_s0 + $0x34] sm:$0xf]  ;;  %229 = vst [vmem:[#allocation2 + $0x2c] sm:$0xf] %v3871_v33  ;;  %v2623_v10 = vcombine.low %v3864_v31, %v3871_v33 }
  0x73   :  { %230 = vst [vmem:[#allocation2 + $0x30] sm:$0xf] %v3877_v34  ;;  %231 = vst [vmem:[#allocation2 + $0x34] sm:$0xf] %v3882_v35  ;;  %v3890_v36 = vld [vmem:[%s4221_s0 + $0x38] sm:$0xf]  ;;  %v2624_v11 = vcombine.low %v3877_v34, %v3882_v35 }
  0x74   :  { %v3895_v37 = vld [vmem:[%s4221_s0 + $0x3c] sm:$0xf]  ;;  %232 = vst [vmem:[#allocation2 + $0x38] sm:$0xf] %v3890_v36  ;;  %v500_v39 = vld [vmem:[%s4223_s2 + $0x10] sm:$0xff]  ;;  %v499_v40 = vld [vmem:[%s4223_s2 + $0x8] sm:$0xff]  ;;  %2919 = vmatpush3.bf16.msra.mxu0 %v2629_v41 }
  0x75   :  { %233 = vst [vmem:[#allocation2 + $0x3c] sm:$0xf] %v3895_v37  ;;  %574 = vperm.xlu1 %3309, %v500_v39   ;;  %v501_v42 = vld [vmem:[%s4223_s2 + $0x18] sm:$0xff]  ;;  %569 = vperm.xlu0 %3308, %v499_v40   ;;  %v502_v43 = vld [vmem:[%s4223_s2 + $0x20] sm:$0xff]  ;;  %v503_v44 = vld [vmem:[%s4223_s2 + $0x28] sm:$0xff]  ;;  %v2625_v12 = vcombine.low %v3890_v36, %v3895_v37 }
  0x76   :  { %v3326_v45 = vld [vmem:[#allocation8 + $0x38] sm:$0xff]   ;;  %v3327_v47 = vld [vmem:[#allocation8 + $0x30] sm:$0xff]   ;;  %2920 = vmatprep.subr.bf16.mxu0 %v2628_v46  ;;  %v3329_v51 = vld [vmem:[#allocation8 + $0x28] sm:$0xff]  }
  0x77   :  { %2942 = vmatprep.subr.bf16.mxu1 %v3326_v45  ;;  %v504_v48 = vld [vmem:[%s4223_s2 + $0x30] sm:$0xff]  ;;  %v505_v49 = vld [vmem:[%s4223_s2 + $0x38] sm:$0xff]  ;;  %v506_v52 = vld [vmem:[%s4223_s2 + $0x40] sm:$0xff] }
  0x78   :  { %2943 = vmatpush3.bf16.msra.mxu1 %v3326_v45  ;;  %2921 = vmatpush3.bf16.msra.mxu0 %v2628_v46  ;;  %v507_v53 = vld [vmem:[%s4223_s2 + $0x48] sm:$0xff]  ;;  %v3331_v55 = vld [vmem:[#allocation8 + $0x20] sm:$0xff]   ;;  %v508_v56 = vld [vmem:[%s4223_s2 + $0x50] sm:$0xff] }
  0x79   :  { %579 = vperm.xlu1 %3309, %v501_v42   ;;  %584 = vperm.xlu0 %3308, %v502_v43   ;;  %v509_v57 = vld [vmem:[%s4223_s2 + $0x58] sm:$0xff]  ;;  %v510_v60 = vld [vmem:[%s4223_s2 + $0x60] sm:$0xff]  ;;  %v511_v62 = vld [vmem:[%s4223_s2 + $0x68] sm:$0xff] }
  0x7a   :  { %2944 = vmatprep.subr.bf16.mxu1 %v3327_v47  ;;  %2922 = vmatprep.subr.bf16.mxu0 %v2627_v50  ;;  %v3328_v58 = vld [vmem:[#allocation5 + $0x38] sm:$0xff]   ;;  %v3330_v0 = vld [vmem:[#allocation5 + $0x30] sm:$0xff]   ;;  %v3332_v4 = vld [vmem:[#allocation5 + $0x28] sm:$0xff]  }
  0x7b   :  { %v3333_v59 = vld [vmem:[#allocation8 + $0x18] sm:$0xff]   ;;  %v3335_v1 = vld [vmem:[#allocation8 + $0x10] sm:$0xff]   ;;  %v3337_v5 = vld [vmem:[#allocation8 + $0x8] sm:$0xff]  }
  0x7c   :  { %2945 = vmatpush3.bf16.msra.mxu1 %v3327_v47  ;;  %2923 = vmatpush3.bf16.msra.mxu0 %v2627_v50  ;;  %v512_v2 = vld [vmem:[%s4223_s2 + $0x70] sm:$0xff]  ;;  %v513_v3 = vld [vmem:[%s4223_s2 + $0x78] sm:$0xff]  ;;  %v3334_v8 = vld [vmem:[#allocation5 + $0x20] sm:$0xff]  }
  0x7d   :  { %589 = vperm.xlu1 %3309, %v503_v44   ;;  %594 = vperm.xlu0 %3308, %v504_v48   ;;  %v3336_v9 = vld [vmem:[#allocation5 + $0x18] sm:$0xff]   ;;  %v3338_v13 = vld [vmem:[#allocation5 + $0x10] sm:$0xff]   ;;  %v3339_v14 = vld [vmem:[#allocation8] sm:$0xff]  }
  0x7e   :  { %2946 = vmatprep.subr.bf16.mxu1 %v3329_v51  ;;  %2924 = vmatprep.subr.bf16.mxu0 %v2626_v54  ;;  %v3340_v15 = vld [vmem:[#allocation5 + $0x8] sm:$0xff]   ;;  %v3341_v16 = vld [vmem:[#allocation3] sm:$0xff]   ;;  %v3344_v19 = vld [vmem:[#allocation3 + $0x10] sm:$0xff]  }
  0x7f   :  { %v3342_v17 = vld [vmem:[#allocation3 + $0x8] sm:$0xff]   ;;  %2958 = vmatprep.mubr.bf16.mxu1 %v3341_v16  ;;  %v3343_v18 = vld [vmem:[#allocation5] sm:$0xff]   ;;  %v3345_v20 = vld [vmem:[#allocation3 + $0x18] sm:$0xff]  }
  0x80   :  { %2947 = vmatpush3.bf16.msra.mxu1 %v3329_v51  ;;  %2925 = vmatpush3.bf16.msra.mxu0 %v2626_v54  ;;  %v3346_v21 = vld [vmem:[#allocation3 + $0x20] sm:$0xff]   ;;  %v3347_v22 = vld [vmem:[#allocation3 + $0x28] sm:$0xff]   ;;  %v3348_v23 = vld [vmem:[#allocation3 + $0x30] sm:$0xff]  }
  0x81   :  { %599 = vperm.xlu1 %3309, %v505_v49   ;;  %604 = vperm.xlu0 %3308, %v506_v52   ;;  %v3349_v24 = vld [vmem:[#allocation3 + $0x38] sm:$0xff]   ;;  %v3351_v46 = vld [vmem:[#allocation11 + $0x30] sm:$0xff]   ;;  %v3352_v52 = vld [vmem:[#allocation11 + $0x28] sm:$0xff]  }
  0x82   :  { %2948 = vmatprep.subr.bf16.mxu1 %v3331_v55  ;;  %2974 = vmatprep.subr.bf16.mxu0 %v3328_v58  ;;  %v3350_v25 = vld [vmem:[#allocation11 + $0x38] sm:$0xff]  }
  0x83   :  { %2927 = vmatmul.mubr.bf16.vlgmr.msra.gmra.mxu0 %v2619_v61  ;;  %v3353_v61 = vld [vmem:[#allocation11 + $0x20] sm:$0xff]  }
  0x84   :  { %2949 = vmatpush3.bf16.msra.mxu1 %v3331_v55  ;;  %2930 = vmatprep.mubr.bf16.mxu0 %v2620_v63 }
  0x85   :  { %609 = vperm.xlu1 %3309, %v507_v53   ;;  %614 = vperm.xlu0 %3308, %v508_v56  }
  0x86   :  { %2950 = vmatprep.subr.bf16.mxu1 %v3333_v59  ;;  %2975 = vmatpush3.bf16.msra.mxu0 %v3328_v58 }
  0x87   :  { %2976 = vmatprep.subr.bf16.mxu0 %v3330_v0 }
  0x88   :  { %2951 = vmatpush3.bf16.msra.mxu1 %v3333_v59 }
  0x89   :  { %619 = vperm.xlu1 %3309, %v509_v57   ;;  %624 = vperm.xlu0 %3308, %v510_v60  }
  0x8a   :  { %2952 = vmatprep.subr.bf16.mxu1 %v3335_v1  ;;  %2977 = vmatpush3.bf16.msra.mxu0 %v3330_v0 }
  0x8b   :  { %2978 = vmatprep.subr.bf16.mxu0 %v3332_v4  ;;  %2931 = vmatmul.mubr.bf16.gmra.mxu0 %v2621_v6 }
  0x8c   :  { %2953 = vmatpush3.bf16.msra.mxu1 %v3335_v1  ;;  %2934 = vmatprep.mubr.bf16.mxu0 %v2622_v7 }
  0x8d   :  { %629 = vperm.xlu1 %3309, %v511_v62   ;;  %634 = vperm.xlu0 %3308, %v512_v2  }
  0x8e   :  { %2954 = vmatprep.subr.bf16.mxu1 %v3337_v5  ;;  %2979 = vmatpush3.bf16.msra.mxu0 %v3332_v4 }
  0x8f   :  { %2980 = vmatprep.subr.bf16.mxu0 %v3334_v8 }
  0x90   :  { %2955 = vmatpush3.bf16.msra.mxu1 %v3337_v5 }
  0x91   :  { %639 = vperm.xlu1 %3309, %v513_v3   ;;  %2956 = vmatprep.subr.bf16.mxu1 %v3339_v14 }
  0x92   :  { %2981 = vmatpush3.bf16.msra.mxu0 %v3334_v8 }
  0x93   :  { %2982 = vmatprep.subr.bf16.mxu0 %v3336_v9  ;;  %2935 = vmatmul.mubr.bf16.gmra.mxu0 %v2623_v10 }
  0x94   :  { %2938 = vmatprep.mubr.bf16.mxu0 %v2624_v11  ;;  %2957 = vmatpush3.bf16.msra.mxu1 %v3339_v14 }
  0x96   :  { %2983 = vmatpush3.bf16.msra.mxu0 %v3336_v9 }
  0x97   :  { %2984 = vmatprep.subr.bf16.mxu0 %v3338_v13  ;;  %2959 = vmatmul.mubr.bf16.vlgmr.msra.gmra.mxu1 %v3342_v17 }
  0x98   :  { %2962 = vmatprep.mubr.bf16.mxu1 %v3344_v19 }
  0x9a   :  { %2985 = vmatpush3.bf16.msra.mxu0 %v3338_v13 }
  0x9b   :  { %2939 = vmatmul.mubr.bf16.gmra.mxu0 %v2625_v12  ;;  %2986 = vmatprep.subr.bf16.mxu0 %v3340_v15 }
  0x9e   :  { %2987 = vmatpush3.bf16.msra.mxu0 %v3340_v15 }
  0x9f   :  { %2988 = vmatprep.subr.bf16.mxu0 %v3343_v18  ;;  %2963 = vmatmul.mubr.bf16.gmra.mxu1 %v3345_v20 }
  0xa0   :  { %2966 = vmatprep.mubr.bf16.mxu1 %v3346_v21  ;;  %v3354_v21 = vld [vmem:[#allocation11 + $0x18] sm:$0xff]  }
  0xa2   :  { %2989 = vmatpush3.bf16.msra.mxu0 %v3343_v18 }
  0xa3   :  { %3038 = vmatprep.subr.bf16.mxu0 %v3350_v25 }
  0xa7   :  { %2967 = vmatmul.mubr.bf16.gmra.mxu1 %v3347_v22  ;;  %v3355_v22 = vld [vmem:[#allocation11 + $0x10] sm:$0xff]  }
  0xa8   :  { %2970 = vmatprep.mubr.bf16.mxu1 %v3348_v23  ;;  %v3356_v23 = vld [vmem:[#allocation11 + $0x8] sm:$0xff]  }
  0xaf   :  { %2971 = vmatmul.mubr.bf16.gmra.mxu1 %v3349_v24  ;;  %v3357_v24 = vld [vmem:[#allocation11] sm:$0xff]  }
  0xdc   :  { %v3970_v27 = vpop.permute.xlu0 %564 }
  0xf0   :  { %v3968_v26 = vpop.permute.xlu1 %574  ;;  %v3974_v29 = vpop.permute.xlu0 %569 }
  0xf4   :  { %v3972_v28 = vpop.permute.xlu1 %579  ;;  %v3978_v32 = vpop.permute.xlu0 %584 }
  0xf8   :  { %v3976_v30 = vpop.permute.xlu1 %589  ;;  %v3983_v38 = vpop.permute.xlu0 %594 }
  0xfc   :  { %v3980_v35 = vpop.permute.xlu1 %599  ;;  %v3990_v49 = vpop.permute.xlu0 %604 }
 0x100   :  { %v3988_v47 = vpop.permute.xlu1 %609  ;;  %v3998_v62 = vpop.permute.xlu0 %614 }
 0x104   :  { %v3996_v57 = vpop.permute.xlu1 %619  ;;  %v4006_v7 = vpop.permute.xlu0 %624 }
 0x108   :  { %v4001_v2 = vpop.permute.xlu1 %629  ;;  %v4011_v15 = vpop.permute.xlu0 %634 }
 0x10c   :  { %v4008_v12 = vpop.permute.xlu1 %639 }
 0x143   :  { %v2928_v31 = vpop.f32.mrf.mxu0 }
 0x144   :  { %v644_v41 = vmul.f32 %v2928_v31, %v3968_v26 }
 0x145   :  { %v400_v33 = vpop.f32.mrf.mxu0 }
 0x146   :  { %v642_v39 = vmul.f32 %v3970_v27, %v400_v33 }
 0x147   :  { %v2929_v34 = vpop.f32.mrf.mxu0 }
 0x148   :  { %v645_v36 = vmul.f32 %v2929_v34, %v3972_v28 }
 0x149   :  { %v403_v37 = vpop.f32.mrf.mxu0 }
 0x14a   :  { %v643_v40 = vmul.f32 %v3974_v29, %v403_v37  ;;  %v659_v44 = vpack.c.bf16 %v645_v36, %v644_v41 }
 0x14b   :  { %v2932_v42 = vpop.f32.mrf.mxu0 }
 0x14c   :  { %v658_v43 = vpack.c.bf16 %v643_v40, %v642_v39  ;;  %v648_v55 = vmul.f32 %v2932_v42, %v3983_v38 }
 0x14d   :  { %v416_v45 = vpop.f32.mrf.mxu0 }
 0x14e   :  { %2990 = vmatprep.mubr.bf16.mxu0 %v658_v43  ;;  %v646_v53 = vmul.f32 %v3978_v32, %v416_v45 }
 0x14f   :  { %v2933_v48 = vpop.f32.mrf.mxu0  ;;  %2991 = vmatmul.mubr.bf16.vlgmr.msra.gmra.mxu0 %v659_v44 }
 0x150   :  { %3039 = vmatpush3.bf16.msra.mxu0 %v3350_v25  ;;  %v649_v50 = vmul.f32 %v2933_v48, %v3980_v35  ;;  %v4016_v25 = vld [vmem:[#allocation2] sm:$0xff]  }
 0x151   :  { %v419_v51 = vpop.f32.mrf.mxu0  ;;  %3040 = vmatprep.subr.bf16.mxu0 %v3351_v46  ;;  %3022 = vmatprep.mubr.bf16.mxu1 %v4016_v25 }
 0x152   :  { %v647_v54 = vmul.f32 %v3976_v30, %v419_v51  ;;  %v661_v59 = vpack.c.bf16 %v649_v50, %v648_v55  ;;  %v4022_v50 = vld [vmem:[%s4226_s5] ss:$0 sm:$0xff] }
 0x153   :  { %v2936_v56 = vpop.f32.mrf.mxu0 }
 0x154   :  { %v660_v58 = vpack.c.bf16 %v647_v54, %v646_v53  ;;  %3041 = vmatpush3.bf16.msra.mxu0 %v3351_v46  ;;  %v652_v5 = vmul.f32 %v2936_v56, %v3998_v62 }
 0x155   :  { %v432_v60 = vpop.f32.mrf.mxu0  ;;  %3042 = vmatprep.subr.bf16.mxu0 %v3352_v52 }
 0x156   :  { %2994 = vmatprep.mubr.bf16.mxu0 %v660_v58  ;;  %v650_v3 = vmul.f32 %v3990_v49, %v432_v60 }
 0x157   :  { %v2937_v63 = vpop.f32.mrf.mxu0  ;;  %2995 = vmatmul.mubr.bf16.gmra.mxu0 %v661_v59  ;;  %v2960_v31 = vpop.f32.mrf.mxu1 }
 0x158   :  { %3043 = vmatpush3.bf16.msra.mxu0 %v3352_v52  ;;  %v653_v0 = vmul.f32 %v2937_v63, %v3996_v57 }
 0x159   :  { %v435_v1 = vpop.f32.mrf.mxu0  ;;  %3044 = vmatprep.subr.bf16.mxu0 %v3353_v61  ;;  %v828_v33 = vpop.f32.mrf.mxu1 }
 0x15a   :  { %v651_v4 = vmul.f32 %v3988_v47, %v435_v1  ;;  %v663_v9 = vpack.c.bf16 %v653_v0, %v652_v5 }
 0x15b   :  { %v2940_v6 = vpop.f32.mrf.mxu0  ;;  %v2961_v34 = vpop.f32.mrf.mxu1 }
 0x15c   :  { %v662_v8 = vpack.c.bf16 %v651_v4, %v650_v3  ;;  %3045 = vmatpush3.bf16.msra.mxu0 %v3353_v61  ;;  %v656_v18 = vmul.f32 %v2940_v6, %v4011_v15 }
 0x15d   :  { %v448_v10 = vpop.f32.mrf.mxu0  ;;  %3046 = vmatprep.subr.bf16.mxu0 %v3354_v21  ;;  %v831_v36 = vpop.f32.mrf.mxu1 }
 0x15e   :  { %2998 = vmatprep.mubr.bf16.mxu0 %v662_v8  ;;  %v654_v16 = vmul.f32 %v4006_v7, %v448_v10 }
 0x15f   :  { %v2941_v11 = vpop.f32.mrf.mxu0  ;;  %2999 = vmatmul.mubr.bf16.gmra.mxu0 %v663_v9  ;;  %v2964_v37 = vpop.f32.mrf.mxu1 }
 0x160   :  { %v657_v13 = vmul.f32 %v2941_v11, %v4008_v12  ;;  %3047 = vmatpush3.bf16.msra.mxu0 %v3354_v21 }
 0x161   :  { %v451_v14 = vpop.f32.mrf.mxu0  ;;  %3048 = vmatprep.subr.bf16.mxu0 %v3355_v22  ;;  %v844_v39 = vpop.f32.mrf.mxu1 }
 0x162   :  { %v655_v17 = vmul.f32 %v4001_v2, %v451_v14  ;;  %v665_v20 = vpack.c.bf16 %v657_v13, %v656_v18 }
 0x163   :  { %v2965_v40 = vpop.f32.mrf.mxu1 }
 0x164   :  { %v664_v19 = vpack.c.bf16 %v655_v17, %v654_v16  ;;  %3049 = vmatpush3.bf16.msra.mxu0 %v3355_v22 }
 0x165   :  { %3050 = vmatprep.subr.bf16.mxu0 %v3356_v23  ;;  %v847_v41 = vpop.f32.mrf.mxu1 }
 0x166   :  { %3002 = vmatprep.mubr.bf16.mxu0 %v664_v19 }
 0x167   :  { %3003 = vmatmul.mubr.bf16.gmra.mxu0 %v665_v20  ;;  %v2968_v44 = vpop.f32.mrf.mxu1 }
 0x168   :  { %3051 = vmatpush3.bf16.msra.mxu0 %v3356_v23 }
 0x169   :  { %3052 = vmatprep.subr.bf16.mxu0 %v3357_v24  ;;  %v860_v53 = vpop.f32.mrf.mxu1 }
 0x16b   :  { %v2969_v0 = vpop.f32.mrf.mxu1 }
 0x16c   :  { %3053 = vmatpush3.bf16.msra.mxu0 %v3357_v24 }
 0x16d   :  { %v863_v14 = vpop.f32.mrf.mxu1 }
 0x16f   :  { %v2972_v23 = vpop.f32.mrf.mxu1 }
 0x20f   :  { %v2992_v42 = vpop.f32.mrf.mxu0 }
 0x210   :  { %v982_v46 = vadd.f32 %v2992_v42, %v2960_v31  ;;  %v876_v42 = vpop.f32.mrf.mxu1 }
 0x211   :  { %v973_v43 = vpop.f32.mrf.mxu0 }
 0x212   :  { %v974_v45 = vadd.f32 %v973_v43, %v828_v33  ;;  %v1045_v58 = vadd.f32 %v4022_v50, %v982_v46 }
 0x213   :  { %v2993_v48 = vpop.f32.mrf.mxu0 }
 0x214   :  { %v985_v51 = vadd.f32 %v2993_v48, %v2961_v34  ;;  %v1043_v54 = vadd.f32 %v4022_v50, %v974_v45  ;;  %v1061_v5 = vmax.f32 %v1045_v58, 0.0 }
 0x215   :  { %v976_v52 = vpop.f32.mrf.mxu0 }
 0x216   :  { %v1046_v55 = vadd.f32 %v4022_v50, %v985_v51  ;;  %v977_v56 = vadd.f32 %v976_v52, %v831_v36  ;;  %v1059_v1 = vmax.f32 %v1043_v54, 0.0 }
 0x217   :  { %v2996_v59 = vpop.f32.mrf.mxu0 }
 0x218   :  { %v1044_v60 = vadd.f32 %v4022_v50, %v977_v56  ;;  %v1062_v61 = vmax.f32 %v1046_v55, 0.0  ;;  %v998_v6 = vadd.f32 %v2996_v59, %v2964_v37  ;;  %v2973_v56 = vpop.f32.mrf.mxu1 }
 0x219   :  { %v989_v63 = vpop.f32.mrf.mxu0 }
 0x21a   :  { %v1060_v3 = vmax.f32 %v1044_v60, 0.0  ;;  %v990_v4 = vadd.f32 %v989_v63, %v844_v39  ;;  %v4030_v11 = vpack.c.bf16 %v1062_v61, %v1061_v5  ;;  %v1049_v19 = vadd.f32 %v4022_v50, %v998_v6  ;;  %v879_v5 = vpop.f32.mrf.mxu1 }
 0x21b   :  { %v2997_v8 = vpop.f32.mrf.mxu0 }
 0x21c   :  { %v1001_v9 = vadd.f32 %v2997_v8, %v2965_v40  ;;  %v4028_v10 = vpack.c.bf16 %v1060_v3, %v1059_v1  ;;  %v1047_v16 = vadd.f32 %v4022_v50, %v990_v4  ;;  %v1065_v36 = vmax.f32 %v1049_v19, 0.0 }
 0x21d   :  { %v992_v13 = vpop.f32.mrf.mxu0 }
 0x21e   :  { %v1050_v17 = vadd.f32 %v4022_v50, %v1001_v9  ;;  %v993_v18 = vadd.f32 %v992_v13, %v847_v41  ;;  %3054 = vmatprep.mubr.bf16.mxu0 %v4028_v10  ;;  %v1063_v31 = vmax.f32 %v1047_v16, 0.0 }
 0x21f   :  { %v3000_v20 = vpop.f32.mrf.mxu0  ;;  %3055 = vmatmul.mubr.bf16.vlgmr.msra.gmra.mxu0 %v4030_v11 }
 0x220   :  { %v1048_v21 = vadd.f32 %v4022_v50, %v993_v18  ;;  %v1066_v22 = vmax.f32 %v1050_v17, 0.0  ;;  %v1014_v37 = vadd.f32 %v3000_v20, %v2968_v44 }
 0x221   :  { %v1005_v24 = vpop.f32.mrf.mxu0 }
 0x222   :  { %v1064_v33 = vmax.f32 %v1048_v21, 0.0  ;;  %v1006_v34 = vadd.f32 %v1005_v24, %v860_v53  ;;  %v1078_v45 = vpack.c.bf16 %v1066_v22, %v1065_v36  ;;  %v1053_v52 = vadd.f32 %v4022_v50, %v1014_v37  ;;  %v4057_v24 = vld [vmem:[#allocation2 + $0x18] sm:$0xff]   ;;  %v3367_v36 = vld [vmem:[#allocation10 + $0x30] sm:$0xff]   ;;  %v3368_v37 = vld [vmem:[#allocation10 + $0x28] sm:$0xff]  }
 0x223   :  { %v3001_v39 = vpop.f32.mrf.mxu0 }
 0x224   :  { %v1017_v40 = vadd.f32 %v3001_v39, %v2969_v0  ;;  %v1077_v41 = vpack.c.bf16 %v1064_v33, %v1063_v31  ;;  %v1051_v46 = vadd.f32 %v4022_v50, %v1006_v34  ;;  %v1069_v63 = vmax.f32 %v1053_v52, 0.0  ;;  %v4059_v31 = vld [vmem:[#allocation2 + $0x20] sm:$0xff]   ;;  %v4065_v33 = vld [vmem:[#allocation2 + $0x30] sm:$0xff]   ;;  %v3366_v34 = vld [vmem:[#allocation10 + $0x38] sm:$0xff]  }
 0x225   :  { %v1008_v43 = vpop.f32.mrf.mxu0  ;;  %v3369_v39 = vld [vmem:[#allocation10 + $0x20] sm:$0xff]  }
 0x226   :  { %v1054_v48 = vadd.f32 %v4022_v50, %v1017_v40  ;;  %v1009_v51 = vadd.f32 %v1008_v43, %v863_v14  ;;  %3058 = vmatprep.mubr.bf16.mxu0 %v1077_v41  ;;  %v1067_v59 = vmax.f32 %v1051_v46, 0.0  ;;  %v3370_v40 = vld [vmem:[#allocation10 + $0x18] sm:$0xff]   ;;  %v3373_v43 = vld [vmem:[#allocation10] sm:$0xff]  }
 0x227   :  { %v3004_v54 = vpop.f32.mrf.mxu0  ;;  %3059 = vmatmul.mubr.bf16.gmra.mxu0 %v1078_v45 }
 0x228   :  { %v1052_v53 = vadd.f32 %v4022_v50, %v1009_v51  ;;  %v1030_v55 = vadd.f32 %v3004_v54, %v2972_v23  ;;  %v1070_v44 = vmax.f32 %v1054_v48, 0.0  ;;  %v4053_v23 = vld [vmem:[#allocation2 + $0x10] sm:$0xff]  }
 0x229   :  { %v1021_v58 = vpop.f32.mrf.mxu0 }
 0x22a   :  { %v1068_v60 = vmax.f32 %v1052_v53, 0.0  ;;  %v1022_v61 = vadd.f32 %v1021_v58, %v876_v42  ;;  %v1057_v1 = vadd.f32 %v4022_v50, %v1030_v55  ;;  %v1080_v8 = vpack.c.bf16 %v1070_v44, %v1069_v63  ;;  %v3372_v42 = vld [vmem:[#allocation10 + $0x8] sm:$0xff]  }
 0x22b   :  { %v3005_v0 = vpop.f32.mrf.mxu0 }
 0x22c   :  { %v1033_v3 = vadd.f32 %v3005_v0, %v2973_v56  ;;  %v1079_v4 = vpack.c.bf16 %v1068_v60, %v1067_v59  ;;  %v1055_v9 = vadd.f32 %v4022_v50, %v1022_v61  ;;  %v1073_v16 = vmax.f32 %v1057_v1, 0.0  ;;  %v3375_v61 = vld [vmem:[#allocation14 + $0x30] sm:$0xff]  }
 0x22d   :  { %v1024_v6 = vpop.f32.mrf.mxu0 }
 0x22e   :  { %v1058_v13 = vadd.f32 %v4022_v50, %v1033_v3  ;;  %v1025_v14 = vadd.f32 %v1024_v6, %v879_v5  ;;  %3062 = vmatprep.mubr.bf16.mxu0 %v1079_v4  ;;  %v1071_v19 = vmax.f32 %v1055_v9, 0.0  ;;  %v3376_v3 = vld [vmem:[#allocation14 + $0x28] sm:$0xff]  }
 0x22f   :  { %3063 = vmatmul.mubr.bf16.gmra.mxu0 %v1080_v8 }
 0x230   :  { %v1074_v17 = vmax.f32 %v1058_v13, 0.0  ;;  %v1056_v18 = vadd.f32 %v4022_v50, %v1025_v14  ;;  %v4050_v50 = vld [vmem:[#allocation2 + $0x8] sm:$0xff]  }
 0x232   :  { %v1072_v20 = vmax.f32 %v1056_v18, 0.0  ;;  %v1082_v21 = vpack.c.bf16 %v1074_v17, %v1073_v16  ;;  %v3377_v16 = vld [vmem:[#allocation14 + $0x20] sm:$0xff]  }
 0x234   :  { %3006 = vmatprep.subr.bf16.mxu1 %v1082_v21  ;;  %v1081_v22 = vpack.c.bf16 %v1072_v20, %v1071_v19 }
 0x235   :  { %3007 = vmatpush3.bf16.msra.mxu1 %v1082_v21 }
 0x236   :  { %3008 = vmatprep.subr.bf16.mxu1 %v1081_v22  ;;  %3066 = vmatprep.mubr.bf16.mxu0 %v1081_v22 }
 0x237   :  { %3067 = vmatmul.mubr.bf16.gmra.mxu0 %v1082_v21 }
 0x238   :  { %3118 = vmatprep.mubr.bf16.mxu0 %v4016_v25 }
 0x239   :  { %3009 = vmatpush3.bf16.msra.mxu1 %v1081_v22 }
 0x23a   :  { %3010 = vmatprep.subr.bf16.mxu1 %v1080_v8 }
 0x23d   :  { %3011 = vmatpush3.bf16.msra.mxu1 %v1080_v8 }
 0x23e   :  { %3012 = vmatprep.subr.bf16.mxu1 %v1079_v4 }
 0x241   :  { %3013 = vmatpush3.bf16.msra.mxu1 %v1079_v4 }
 0x242   :  { %3014 = vmatprep.subr.bf16.mxu1 %v1078_v45 }
 0x245   :  { %3015 = vmatpush3.bf16.msra.mxu1 %v1078_v45  ;;  %v3374_v45 = vld [vmem:[#allocation14 + $0x38] sm:$0xff]  }
 0x246   :  { %3016 = vmatprep.subr.bf16.mxu1 %v1077_v41 }
 0x249   :  { %3017 = vmatpush3.bf16.msra.mxu1 %v1077_v41  ;;  %v3371_v41 = vld [vmem:[#allocation10 + $0x10] sm:$0xff]  }
 0x24a   :  { %3018 = vmatprep.subr.bf16.mxu1 %v4030_v11 }
 0x24d   :  { %3019 = vmatpush3.bf16.msra.mxu1 %v4030_v11  ;;  %v4063_v11 = vld [vmem:[#allocation2 + $0x28] sm:$0xff]  }
 0x24e   :  { %3020 = vmatprep.subr.bf16.mxu1 %v4028_v10 }
 0x251   :  { %3021 = vmatpush3.bf16.msra.mxu1 %v4028_v10  ;;  %v4069_v10 = vld [vmem:[#allocation2 + $0x38] sm:$0xff]  }
 0x252   :  { %3070 = vmatprep.subr.bf16.mxu1 %v3366_v34 }
 0x254   :  { %3023 = vmatmul.mubr.bf16.vlgmr.msra.gmra.mxu1 %v4050_v50 }
 0x255   :  { %3026 = vmatprep.mubr.bf16.mxu1 %v4053_v23  ;;  %3071 = vmatpush3.bf16.msra.mxu1 %v3366_v34 }
 0x256   :  { %3072 = vmatprep.subr.bf16.mxu1 %v3367_v36 }
 0x259   :  { %3073 = vmatpush3.bf16.msra.mxu1 %v3367_v36 }
 0x25a   :  { %3074 = vmatprep.subr.bf16.mxu1 %v3368_v37 }
 0x25c   :  { %3027 = vmatmul.mubr.bf16.gmra.mxu1 %v4057_v24 }
 0x25d   :  { %3030 = vmatprep.mubr.bf16.mxu1 %v4059_v31  ;;  %3075 = vmatpush3.bf16.msra.mxu1 %v3368_v37 }
 0x25e   :  { %3076 = vmatprep.subr.bf16.mxu1 %v3369_v39 }
 0x261   :  { %3077 = vmatpush3.bf16.msra.mxu1 %v3369_v39 }
 0x262   :  { %3078 = vmatprep.subr.bf16.mxu1 %v3370_v40 }
 0x264   :  { %3031 = vmatmul.mubr.bf16.gmra.mxu1 %v4063_v11 }
 0x265   :  { %3034 = vmatprep.mubr.bf16.mxu1 %v4065_v33  ;;  %3079 = vmatpush3.bf16.msra.mxu1 %v3370_v40 }
 0x266   :  { %3080 = vmatprep.subr.bf16.mxu1 %v3371_v41 }
 0x269   :  { %3081 = vmatpush3.bf16.msra.mxu1 %v3371_v41 }
 0x26a   :  { %3082 = vmatprep.subr.bf16.mxu1 %v3372_v42 }
 0x26c   :  { %3035 = vmatmul.mubr.bf16.gmra.mxu1 %v4069_v10 }
 0x26d   :  { %3083 = vmatpush3.bf16.msra.mxu1 %v3372_v42 }
 0x26e   :  { %3084 = vmatprep.subr.bf16.mxu1 %v3373_v43 }
 0x271   :  { %3085 = vmatpush3.bf16.msra.mxu1 %v3373_v43 }
 0x272   :  { %3134 = vmatprep.subr.bf16.mxu1 %v3374_v45 }
 0x314   :  { %v3024_v46 = vpop.f32.mrf.mxu1 }
 0x315   :  { %v1230_v44 = vmul.f32 %v3024_v46, %v3968_v26 }
 0x316   :  { %v1165_v48 = vpop.f32.mrf.mxu1 }
 0x317   :  { %v1228_v53 = vmul.f32 %v1165_v48, %v3970_v27 }
 0x318   :  { %v3025_v51 = vpop.f32.mrf.mxu1 }
 0x319   :  { %v1231_v52 = vmul.f32 %v3025_v51, %v3972_v28 }
 0x31a   :  { %v1168_v54 = vpop.f32.mrf.mxu1 }
 0x31b   :  { %v1229_v55 = vmul.f32 %v1168_v54, %v3974_v29  ;;  %v1245_v59 = vpack.c.bf16 %v1231_v52, %v1230_v44  ;;  %v3378_v52 = vld [vmem:[#allocation14 + $0x18] sm:$0xff]   ;;  %v3379_v54 = vld [vmem:[#allocation14 + $0x10] sm:$0xff]   ;;  %v3056_v44 = vpop.f32.mrf.mxu0 }
 0x31c   :  { %v3028_v56 = vpop.f32.mrf.mxu1 }
 0x31d   :  { %v1244_v58 = vpack.c.bf16 %v1229_v55, %v1228_v53  ;;  %v1234_v6 = vmul.f32 %v3028_v56, %v3983_v38  ;;  %v3380_v53 = vld [vmem:[#allocation14 + $0x8] sm:$0xff]   ;;  %v3381_v55 = vld [vmem:[#allocation14] sm:$0xff]   ;;  %v1366_v56 = vpop.f32.mrf.mxu0 }
 0x31e   :  { %v1181_v60 = vpop.f32.mrf.mxu1 }
 0x31f   :  { %3086 = vmatprep.mubr.bf16.mxu1 %v1244_v58  ;;  %v1232_v4 = vmul.f32 %v1181_v60, %v3978_v32  ;;  %v3057_v58 = vpop.f32.mrf.mxu0 }
 0x320   :  { %v3029_v63 = vpop.f32.mrf.mxu1  ;;  %3087 = vmatmul.mubr.bf16.vlgmr.msra.gmra.mxu1 %v1245_v59 }
 0x321   :  { %3135 = vmatpush3.bf16.msra.mxu1 %v3374_v45  ;;  %v1235_v0 = vmul.f32 %v3029_v63, %v3980_v35  ;;  %v1369_v59 = vpop.f32.mrf.mxu0 }
 0x322   :  { %v1184_v1 = vpop.f32.mrf.mxu1  ;;  %3136 = vmatprep.subr.bf16.mxu1 %v3375_v61 }
 0x323   :  { %v1233_v5 = vmul.f32 %v1184_v1, %v3976_v30  ;;  %v1247_v13 = vpack.c.bf16 %v1235_v0, %v1234_v6  ;;  %v3060_v60 = vpop.f32.mrf.mxu0 }
 0x324   :  { %v3032_v8 = vpop.f32.mrf.mxu1 }
 0x325   :  { %v1246_v9 = vpack.c.bf16 %v1233_v5, %v1232_v4  ;;  %3137 = vmatpush3.bf16.msra.mxu1 %v3375_v61  ;;  %v1238_v22 = vmul.f32 %v3032_v8, %v3998_v62  ;;  %v1382_v61 = vpop.f32.mrf.mxu0 }
 0x326   :  { %v1197_v14 = vpop.f32.mrf.mxu1  ;;  %3138 = vmatprep.subr.bf16.mxu1 %v3376_v3 }
 0x327   :  { %3090 = vmatprep.mubr.bf16.mxu1 %v1246_v9  ;;  %v1236_v20 = vmul.f32 %v1197_v14, %v3990_v49  ;;  %v3061_v63 = vpop.f32.mrf.mxu0  ;;  %v4091_v9 = vld [vmem:[%s4229_s8] ss:$0 sm:$0xff] }
 0x328   :  { %v3033_v17 = vpop.f32.mrf.mxu1  ;;  %3091 = vmatmul.mubr.bf16.gmra.mxu1 %v1247_v13 }
 0x329   :  { %3139 = vmatpush3.bf16.msra.mxu1 %v3376_v3  ;;  %v1239_v18 = vmul.f32 %v3033_v17, %v3996_v57  ;;  %v1385_v0 = vpop.f32.mrf.mxu0 }
 0x32a   :  { %v1200_v19 = vpop.f32.mrf.mxu1  ;;  %3140 = vmatprep.subr.bf16.mxu1 %v3377_v16 }
 0x32b   :  { %v1237_v21 = vmul.f32 %v1200_v19, %v3988_v47  ;;  %v1249_v37 = vpack.c.bf16 %v1239_v18, %v1238_v22  ;;  %v3064_v3 = vpop.f32.mrf.mxu0 }
 0x32c   :  { %v3036_v34 = vpop.f32.mrf.mxu1 }
 0x32d   :  { %v1248_v36 = vpack.c.bf16 %v1237_v21, %v1236_v20  ;;  %3141 = vmatpush3.bf16.msra.mxu1 %v3377_v16  ;;  %v1242_v46 = vmul.f32 %v3036_v34, %v4011_v15  ;;  %v1398_v14 = vpop.f32.mrf.mxu0 }
 0x32e   :  { %v1213_v39 = vpop.f32.mrf.mxu1  ;;  %3142 = vmatprep.subr.bf16.mxu1 %v3378_v52 }
 0x32f   :  { %3094 = vmatprep.mubr.bf16.mxu1 %v1248_v36  ;;  %v1240_v43 = vmul.f32 %v1213_v39, %v4006_v7  ;;  %v3065_v34 = vpop.f32.mrf.mxu0 }
 0x330   :  { %v3037_v40 = vpop.f32.mrf.mxu1  ;;  %3095 = vmatmul.mubr.bf16.gmra.mxu1 %v1249_v37 }
 0x331   :  { %v1243_v41 = vmul.f32 %v3037_v40, %v4008_v12  ;;  %3143 = vmatpush3.bf16.msra.mxu1 %v3378_v52 }
 0x332   :  { %v1216_v42 = vpop.f32.mrf.mxu1  ;;  %3144 = vmatprep.subr.bf16.mxu1 %v3379_v54 }
 0x333   :  { %v1241_v45 = vmul.f32 %v1216_v42, %v4001_v2  ;;  %v1251_v51 = vpack.c.bf16 %v1243_v41, %v1242_v46 }
 0x335   :  { %v1250_v48 = vpack.c.bf16 %v1241_v45, %v1240_v43  ;;  %3145 = vmatpush3.bf16.msra.mxu1 %v3379_v54 }
 0x336   :  { %3146 = vmatprep.subr.bf16.mxu1 %v3380_v53 }
 0x337   :  { %3098 = vmatprep.mubr.bf16.mxu1 %v1250_v48 }
 0x338   :  { %3099 = vmatmul.mubr.bf16.gmra.mxu1 %v1251_v51  ;;  %v1401_v51 = vpop.f32.mrf.mxu0 }
 0x339   :  { %3147 = vmatpush3.bf16.msra.mxu1 %v3380_v53 }
 0x33a   :  { %3148 = vmatprep.subr.bf16.mxu1 %v3381_v55 }
 0x33d   :  { %3149 = vmatpush3.bf16.msra.mxu1 %v3381_v55 }
 0x3e0   :  { %v3088_v1 = vpop.f32.mrf.mxu1 }
 0x3e1   :  { %v1520_v6 = vadd.f32 %v3088_v1, %v3056_v44 }
 0x3e2   :  { %v1511_v4 = vpop.f32.mrf.mxu1 }
 0x3e3   :  { %v1512_v5 = vadd.f32 %v1511_v4, %v1366_v56  ;;  %v1583_v20 = vadd.f32 %v4091_v9, %v1520_v6 }
 0x3e4   :  { %v3089_v8 = vpop.f32.mrf.mxu1 }
 0x3e5   :  { %v1523_v13 = vadd.f32 %v3089_v8, %v3057_v58  ;;  %v1581_v17 = vadd.f32 %v4091_v9, %v1512_v5  ;;  %v1599_v42 = vmax.f32 %v1583_v20, 0.0 }
 0x3e6   :  { %v1514_v16 = vpop.f32.mrf.mxu1 }
 0x3e7   :  { %v1584_v18 = vadd.f32 %v4091_v9, %v1523_v13  ;;  %v1515_v19 = vadd.f32 %v1514_v16, %v1369_v59  ;;  %v1597_v39 = vmax.f32 %v1581_v17, 0.0 }
 0x3e8   :  { %v3092_v21 = vpop.f32.mrf.mxu1 }
 0x3e9   :  { %v1582_v22 = vadd.f32 %v4091_v9, %v1515_v19  ;;  %v1600_v36 = vmax.f32 %v1584_v18, 0.0  ;;  %v1536_v43 = vadd.f32 %v3092_v21, %v3060_v60  ;;  %v3068_v60 = vpop.f32.mrf.mxu0 }
 0x3ea   :  { %v1527_v37 = vpop.f32.mrf.mxu1 }
 0x3eb   :  { %v1598_v40 = vmax.f32 %v1582_v22, 0.0  ;;  %v1528_v41 = vadd.f32 %v1527_v37, %v1382_v61  ;;  %v4099_v52 = vpack.c.bf16 %v1600_v36, %v1599_v42  ;;  %v1587_v56 = vadd.f32 %v4091_v9, %v1536_v43  ;;  %v1414_v17 = vpop.f32.mrf.mxu0 }
 0x3ec   :  { %v3093_v45 = vpop.f32.mrf.mxu1 }
 0x3ed   :  { %v1539_v46 = vadd.f32 %v3093_v45, %v3061_v63  ;;  %v4097_v48 = vpack.c.bf16 %v1598_v40, %v1597_v39  ;;  %v1585_v53 = vadd.f32 %v4091_v9, %v1528_v41  ;;  %v1603_v6 = vmax.f32 %v1587_v56, 0.0 }
 0x3ee   :  { %v1530_v54 = vpop.f32.mrf.mxu1 }
 0x3ef   :  { %v1588_v55 = vadd.f32 %v4091_v9, %v1539_v46  ;;  %v1531_v44 = vadd.f32 %v1530_v54, %v1385_v0  ;;  %3150 = vmatprep.mubr.bf16.mxu1 %v4097_v48  ;;  %v1601_v1 = vmax.f32 %v1585_v53, 0.0 }
 0x3f0   :  { %v3096_v58 = vpop.f32.mrf.mxu1  ;;  %3151 = vmatmul.mubr.bf16.vlgmr.msra.gmra.mxu1 %v4099_v52 }
 0x3f1   :  { %v1586_v59 = vadd.f32 %v4091_v9, %v1531_v44  ;;  %v1604_v61 = vmax.f32 %v1588_v55, 0.0  ;;  %v1552_v8 = vadd.f32 %v3096_v58, %v3064_v3  ;;  %v3069_v3 = vpop.f32.mrf.mxu0 }
 0x3f2   :  { %v1543_v63 = vpop.f32.mrf.mxu1 }
 0x3f3   :  { %v1602_v4 = vmax.f32 %v1586_v59, 0.0  ;;  %v1544_v5 = vadd.f32 %v1543_v63, %v1398_v14  ;;  %v1616_v19 = vpack.c.bf16 %v1604_v61, %v1603_v6  ;;  %v1591_v36 = vadd.f32 %v4091_v9, %v1552_v8  ;;  %v1417_v55 = vpop.f32.mrf.mxu0 }
 0x3f4   :  { %v3097_v13 = vpop.f32.mrf.mxu1 }
 0x3f5   :  { %v1555_v16 = vadd.f32 %v3097_v13, %v3065_v34  ;;  %v1615_v0 = vpack.c.bf16 %v1602_v4, %v1601_v1  ;;  %v1589_v20 = vadd.f32 %v4091_v9, %v1544_v5  ;;  %v1607_v45 = vmax.f32 %v1591_v36, 0.0  ;;  %v3386_v13 = vld [vmem:[#allocation13 + $0x18] sm:$0xff]  }
 0x3f6   :  { %v1546_v18 = vpop.f32.mrf.mxu1 }
 0x3f7   :  { %v1592_v21 = vadd.f32 %v4091_v9, %v1555_v16  ;;  %v1547_v22 = vadd.f32 %v1546_v18, %v1401_v51  ;;  %3154 = vmatprep.mubr.bf16.mxu1 %v1615_v0  ;;  %v1605_v41 = vmax.f32 %v1589_v20, 0.0  ;;  %v3387_v16 = vld [vmem:[#allocation13 + $0x10] sm:$0xff]   ;;  %v3390_v18 = vld [vmem:[#allocation17 + $0x38] sm:$0xff]  }
 0x3f8   :  { %v3100_v37 = vpop.f32.mrf.mxu1  ;;  %3155 = vmatmul.mubr.bf16.gmra.mxu1 %v1616_v19 }
 0x3f9   :  { %v1590_v14 = vadd.f32 %v4091_v9, %v1547_v22  ;;  %v1568_v39 = vadd.f32 %v3100_v37, %v3068_v60  ;;  %v1608_v40 = vmax.f32 %v1592_v21, 0.0 }
 0x3fa   :  { %v1559_v34 = vpop.f32.mrf.mxu1 }
 0x3fb   :  { %v1606_v42 = vmax.f32 %v1590_v14, 0.0  ;;  %v1560_v43 = vadd.f32 %v1559_v34, %v1414_v17  ;;  %v1595_v54 = vadd.f32 %v4091_v9, %v1568_v39  ;;  %v1618_v56 = vpack.c.bf16 %v1608_v40, %v1607_v45  ;;  %v3389_v17 = vld [vmem:[#allocation13] sm:$0xff]  }
 0x3fc   :  { %v3101_v46 = vpop.f32.mrf.mxu1 }
 0x3fd   :  { %v1571_v53 = vadd.f32 %v3101_v46, %v3069_v3  ;;  %v1617_v51 = vpack.c.bf16 %v1606_v42, %v1605_v41  ;;  %v1593_v58 = vadd.f32 %v4091_v9, %v1560_v43  ;;  %v1611_v61 = vmax.f32 %v1595_v54, 0.0  ;;  %v3391_v42 = vld [vmem:[#allocation17 + $0x30] sm:$0xff]   ;;  %v3392_v54 = vld [vmem:[#allocation17 + $0x28] sm:$0xff]  }
 0x3fe   :  { %v1562_v44 = vpop.f32.mrf.mxu1 }
 0x3ff   :  { %v1596_v59 = vadd.f32 %v4091_v9, %v1571_v53  ;;  %v1563_v60 = vadd.f32 %v1562_v44, %v1417_v55  ;;  %3158 = vmatprep.mubr.bf16.mxu1 %v1617_v51  ;;  %v1609_v4 = vmax.f32 %v1593_v58, 0.0 }
 0x400   :  { %3159 = vmatmul.mubr.bf16.gmra.mxu1 %v1618_v56 }
 0x401   :  { %v1612_v63 = vmax.f32 %v1596_v59, 0.0  ;;  %v1594_v1 = vadd.f32 %v4091_v9, %v1563_v60  ;;  %v3383_v9 = vld [vmem:[#allocation13 + $0x30] sm:$0xff]   ;;  %v3393_v60 = vld [vmem:[#allocation17 + $0x20] sm:$0xff]  }
 0x403   :  { %v1610_v5 = vmax.f32 %v1594_v1, 0.0  ;;  %v1620_v6 = vpack.c.bf16 %v1612_v63, %v1611_v61 }
 0x405   :  { %3102 = vmatprep.subr.bf16.mxu0 %v1620_v6  ;;  %v1619_v8 = vpack.c.bf16 %v1610_v5, %v1609_v4 }
 0x406   :  { %3103 = vmatpush3.bf16.msra.mxu0 %v1620_v6 }
 0x407   :  { %3104 = vmatprep.subr.bf16.mxu0 %v1619_v8  ;;  %3162 = vmatprep.mubr.bf16.mxu1 %v1619_v8 }
 0x408   :  { %3163 = vmatmul.mubr.bf16.gmra.mxu1 %v1620_v6 }
 0x409   :  { %3214 = vmatprep.mubr.bf16.mxu1 %v4016_v25  ;;  %v3382_v25 = vld [vmem:[#allocation13 + $0x38] sm:$0xff]  }
 0x40a   :  { %3105 = vmatpush3.bf16.msra.mxu0 %v1619_v8 }
 0x40b   :  { %3106 = vmatprep.subr.bf16.mxu0 %v1618_v56 }
 0x40e   :  { %3107 = vmatpush3.bf16.msra.mxu0 %v1618_v56 }
 0x40f   :  { %3108 = vmatprep.subr.bf16.mxu0 %v1617_v51 }
 0x412   :  { %3109 = vmatpush3.bf16.msra.mxu0 %v1617_v51 }
 0x413   :  { %3110 = vmatprep.subr.bf16.mxu0 %v1616_v19 }
 0x416   :  { %3111 = vmatpush3.bf16.msra.mxu0 %v1616_v19 }
 0x417   :  { %3112 = vmatprep.subr.bf16.mxu0 %v1615_v0 }
 0x41a   :  { %3113 = vmatpush3.bf16.msra.mxu0 %v1615_v0  ;;  %v3388_v0 = vld [vmem:[#allocation13 + $0x8] sm:$0xff]  }
 0x41b   :  { %3114 = vmatprep.subr.bf16.mxu0 %v4099_v52 }
 0x41e   :  { %3115 = vmatpush3.bf16.msra.mxu0 %v4099_v52  ;;  %v3385_v52 = vld [vmem:[#allocation13 + $0x20] sm:$0xff]  }
 0x41f   :  { %3116 = vmatprep.subr.bf16.mxu0 %v4097_v48 }
 0x422   :  { %3117 = vmatpush3.bf16.msra.mxu0 %v4097_v48  ;;  %v3384_v48 = vld [vmem:[#allocation13 + $0x28] sm:$0xff]  }
 0x423   :  { %3166 = vmatprep.subr.bf16.mxu0 %v3382_v25 }
 0x425   :  { %3119 = vmatmul.mubr.bf16.vlgmr.msra.gmra.mxu0 %v4050_v50 }
 0x426   :  { %3122 = vmatprep.mubr.bf16.mxu0 %v4053_v23  ;;  %3167 = vmatpush3.bf16.msra.mxu0 %v3382_v25 }
 0x427   :  { %3168 = vmatprep.subr.bf16.mxu0 %v3383_v9 }
 0x42a   :  { %3169 = vmatpush3.bf16.msra.mxu0 %v3383_v9 }
 0x42b   :  { %3170 = vmatprep.subr.bf16.mxu0 %v3384_v48 }
 0x42d   :  { %3123 = vmatmul.mubr.bf16.gmra.mxu0 %v4057_v24 }
 0x42e   :  { %3126 = vmatprep.mubr.bf16.mxu0 %v4059_v31  ;;  %3171 = vmatpush3.bf16.msra.mxu0 %v3384_v48 }
 0x42f   :  { %3172 = vmatprep.subr.bf16.mxu0 %v3385_v52 }
 0x432   :  { %3173 = vmatpush3.bf16.msra.mxu0 %v3385_v52 }
 0x433   :  { %3174 = vmatprep.subr.bf16.mxu0 %v3386_v13 }
 0x435   :  { %3127 = vmatmul.mubr.bf16.gmra.mxu0 %v4063_v11 }
 0x436   :  { %3130 = vmatprep.mubr.bf16.mxu0 %v4065_v33  ;;  %3175 = vmatpush3.bf16.msra.mxu0 %v3386_v13 }
 0x437   :  { %3176 = vmatprep.subr.bf16.mxu0 %v3387_v16 }
 0x43a   :  { %3177 = vmatpush3.bf16.msra.mxu0 %v3387_v16 }
 0x43b   :  { %3178 = vmatprep.subr.bf16.mxu0 %v3388_v0 }
 0x43d   :  { %3131 = vmatmul.mubr.bf16.gmra.mxu0 %v4069_v10 }
 0x43e   :  { %3179 = vmatpush3.bf16.msra.mxu0 %v3388_v0 }
 0x43f   :  { %3180 = vmatprep.subr.bf16.mxu0 %v3389_v17 }
 0x442   :  { %3181 = vmatpush3.bf16.msra.mxu0 %v3389_v17 }
 0x443   :  { %3230 = vmatprep.subr.bf16.mxu0 %v3390_v18 }
 0x4e5   :  { %v3120_v19 = vpop.f32.mrf.mxu0 }
 0x4e6   :  { %v1720_v39 = vmul.f32 %v3120_v19, %v3968_v26 }
 0x4e7   :  { %v1655_v20 = vpop.f32.mrf.mxu0 }
 0x4e8   :  { %v1718_v37 = vmul.f32 %v1655_v20, %v3970_v27 }
 0x4e9   :  { %v3121_v21 = vpop.f32.mrf.mxu0 }
 0x4ea   :  { %v1721_v22 = vmul.f32 %v3121_v21, %v3972_v28  ;;  %v3394_v21 = vld [vmem:[#allocation17 + $0x18] sm:$0xff]  }
 0x4eb   :  { %v1658_v36 = vpop.f32.mrf.mxu0 }
 0x4ec   :  { %v1719_v14 = vmul.f32 %v1658_v36, %v3974_v29  ;;  %v1735_v34 = vpack.c.bf16 %v1721_v22, %v1720_v39  ;;  %v3395_v22 = vld [vmem:[#allocation17 + $0x10] sm:$0xff]   ;;  %v3396_v36 = vld [vmem:[#allocation17 + $0x8] sm:$0xff]  }
 0x4ed   :  { %v3124_v3 = vpop.f32.mrf.mxu0 }
 0x4ee   :  { %v1734_v40 = vpack.c.bf16 %v1719_v14, %v1718_v37  ;;  %v1724_v55 = vmul.f32 %v3124_v3, %v3983_v38  ;;  %v3397_v37 = vld [vmem:[#allocation17] sm:$0xff]   ;;  %v3152_v14 = vpop.f32.mrf.mxu1 }
 0x4ef   :  { %v1671_v41 = vpop.f32.mrf.mxu0 }
 0x4f0   :  { %3182 = vmatprep.mubr.bf16.mxu0 %v1734_v40  ;;  %v1722_v53 = vmul.f32 %v1671_v41, %v3978_v32  ;;  %v1856_v39 = vpop.f32.mrf.mxu1 }
 0x4f1   :  { %v3125_v43 = vpop.f32.mrf.mxu0  ;;  %3183 = vmatmul.mubr.bf16.vlgmr.msra.gmra.mxu0 %v1735_v34 }
 0x4f2   :  { %3231 = vmatpush3.bf16.msra.mxu0 %v3390_v18  ;;  %v1725_v45 = vmul.f32 %v3125_v43, %v3980_v35  ;;  %v3153_v3 = vpop.f32.mrf.mxu1 }
 0x4f3   :  { %v1674_v46 = vpop.f32.mrf.mxu0  ;;  %3232 = vmatprep.subr.bf16.mxu0 %v3391_v42 }
 0x4f4   :  { %v1723_v51 = vmul.f32 %v1674_v46, %v3976_v30  ;;  %v1737_v58 = vpack.c.bf16 %v1725_v45, %v1724_v55  ;;  %v1859_v40 = vpop.f32.mrf.mxu1 }
 0x4f5   :  { %v3128_v44 = vpop.f32.mrf.mxu0 }
 0x4f6   :  { %v1736_v56 = vpack.c.bf16 %v1723_v51, %v1722_v53  ;;  %3233 = vmatpush3.bf16.msra.mxu0 %v3391_v42  ;;  %v1728_v6 = vmul.f32 %v3128_v44, %v3998_v62  ;;  %v3156_v34 = vpop.f32.mrf.mxu1  ;;  %v4146_v44 = vld [vmem:[%s4232_s11] ss:$0 sm:$0xff] }
 0x4f7   :  { %v1687_v59 = vpop.f32.mrf.mxu0  ;;  %3234 = vmatprep.subr.bf16.mxu0 %v3392_v54 }
 0x4f8   :  { %3186 = vmatprep.mubr.bf16.mxu0 %v1736_v56  ;;  %v1726_v4 = vmul.f32 %v1687_v59, %v3990_v49  ;;  %v1872_v41 = vpop.f32.mrf.mxu1 }
 0x4f9   :  { %v3129_v61 = vpop.f32.mrf.mxu0  ;;  %3187 = vmatmul.mubr.bf16.gmra.mxu0 %v1737_v58 }
 0x4fa   :  { %3235 = vmatpush3.bf16.msra.mxu0 %v3392_v54  ;;  %v1729_v63 = vmul.f32 %v3129_v61, %v3996_v57  ;;  %v3157_v42 = vpop.f32.mrf.mxu1 }
 0x4fb   :  { %v1690_v1 = vpop.f32.mrf.mxu0  ;;  %3236 = vmatprep.subr.bf16.mxu0 %v3393_v60 }
 0x4fc   :  { %v1727_v5 = vmul.f32 %v1690_v1, %v3988_v47  ;;  %v1739_v9 = vpack.c.bf16 %v1729_v63, %v1728_v6  ;;  %v1875_v43 = vpop.f32.mrf.mxu1 }
 0x4fd   :  { %v3132_v8 = vpop.f32.mrf.mxu0 }
 0x4fe   :  { %v1738_v25 = vpack.c.bf16 %v1727_v5, %v1726_v4  ;;  %3237 = vmatpush3.bf16.msra.mxu0 %v3393_v60  ;;  %v1732_v18 = vmul.f32 %v3132_v8, %v4011_v15  ;;  %v3160_v46 = vpop.f32.mrf.mxu1 }
 0x4ff   :  { %v1703_v48 = vpop.f32.mrf.mxu0  ;;  %3238 = vmatprep.subr.bf16.mxu0 %v3394_v21 }
 0x500   :  { %3190 = vmatprep.mubr.bf16.mxu0 %v1738_v25  ;;  %v1730_v0 = vmul.f32 %v1703_v48, %v4006_v7  ;;  %v1888_v58 = vpop.f32.mrf.mxu1 }
 0x501   :  { %v3133_v52 = vpop.f32.mrf.mxu0  ;;  %3191 = vmatmul.mubr.bf16.gmra.mxu0 %v1739_v9 }
 0x502   :  { %v1733_v13 = vmul.f32 %v3133_v52, %v4008_v12  ;;  %3239 = vmatpush3.bf16.msra.mxu0 %v3394_v21  ;;  %v3161_v6 = vpop.f32.mrf.mxu1 }
 0x503   :  { %v1706_v16 = vpop.f32.mrf.mxu0  ;;  %3240 = vmatprep.subr.bf16.mxu0 %v3395_v22 }
 0x504   :  { %v1731_v17 = vmul.f32 %v1706_v16, %v4001_v2  ;;  %v1741_v20 = vpack.c.bf16 %v1733_v13, %v1732_v18 }
 0x506   :  { %v1740_v19 = vpack.c.bf16 %v1731_v17, %v1730_v0  ;;  %3241 = vmatpush3.bf16.msra.mxu0 %v3395_v22 }
 0x507   :  { %3242 = vmatprep.subr.bf16.mxu0 %v3396_v36 }
 0x508   :  { %3194 = vmatprep.mubr.bf16.mxu0 %v1740_v19  ;;  %v1891_v19 = vpop.f32.mrf.mxu1 }
 0x509   :  { %3195 = vmatmul.mubr.bf16.gmra.mxu0 %v1741_v20 }
 0x50a   :  { %3243 = vmatpush3.bf16.msra.mxu0 %v3396_v36 }
 0x50b   :  { %3244 = vmatprep.subr.bf16.mxu0 %v3397_v37 }
 0x50e   :  { %3245 = vmatpush3.bf16.msra.mxu0 %v3397_v37 }
 0x5b1   :  { %v3184_v45 = vpop.f32.mrf.mxu0 }
 0x5b2   :  { %v2010_v51 = vadd.f32 %v3184_v45, %v3152_v14 }
 0x5b3   :  { %v2001_v54 = vpop.f32.mrf.mxu0 }
 0x5b4   :  { %v2002_v53 = vadd.f32 %v2001_v54, %v1856_v39  ;;  %v2073_v1 = vadd.f32 %v4146_v44, %v2010_v51 }
 0x5b5   :  { %v3185_v55 = vpop.f32.mrf.mxu0 }
 0x5b6   :  { %v2013_v56 = vadd.f32 %v3185_v55, %v3153_v3  ;;  %v2071_v60 = vadd.f32 %v4146_v44, %v2002_v53  ;;  %v2089_v13 = vmax.f32 %v2073_v1, 0.0 }
 0x5b7   :  { %v2004_v59 = vpop.f32.mrf.mxu0 }
 0x5b8   :  { %v2074_v61 = vadd.f32 %v4146_v44, %v2013_v56  ;;  %v2005_v63 = vadd.f32 %v2004_v59, %v1859_v40  ;;  %v2087_v9 = vmax.f32 %v2071_v60, 0.0  ;;  %v3164_v40 = vpop.f32.mrf.mxu1 }
 0x5b9   :  { %v3188_v4 = vpop.f32.mrf.mxu0 }
 0x5ba   :  { %v2072_v5 = vadd.f32 %v4146_v44, %v2005_v63  ;;  %v2090_v8 = vmax.f32 %v2074_v61, 0.0  ;;  %v2026_v16 = vadd.f32 %v3188_v4, %v3156_v34  ;;  %v1904_v59 = vpop.f32.mrf.mxu1 }
 0x5bb   :  { %v2017_v25 = vpop.f32.mrf.mxu0 }
 0x5bc   :  { %v2088_v48 = vmax.f32 %v2072_v5, 0.0  ;;  %v2018_v52 = vadd.f32 %v2017_v25, %v1872_v41  ;;  %v4154_v20 = vpack.c.bf16 %v2090_v8, %v2089_v13  ;;  %v2077_v14 = vadd.f32 %v4146_v44, %v2026_v16 }
 0x5bd   :  { %v3189_v0 = vpop.f32.mrf.mxu0 }
 0x5be   :  { %v2029_v17 = vadd.f32 %v3189_v0, %v3157_v42  ;;  %v4152_v18 = vpack.c.bf16 %v2088_v48, %v2087_v9  ;;  %v2075_v22 = vadd.f32 %v4146_v44, %v2018_v52  ;;  %v2093_v53 = vmax.f32 %v2077_v14, 0.0 }
 0x5bf   :  { %v2020_v21 = vpop.f32.mrf.mxu0 }
 0x5c0   :  { %v2078_v36 = vadd.f32 %v4146_v44, %v2029_v17  ;;  %v2021_v37 = vadd.f32 %v2020_v21, %v1875_v43  ;;  %3246 = vmatprep.mubr.bf16.mxu0 %v4152_v18  ;;  %v2091_v42 = vmax.f32 %v2075_v22, 0.0 }
 0x5c1   :  { %v3192_v39 = vpop.f32.mrf.mxu0  ;;  %3247 = vmatmul.mubr.bf16.vlgmr.msra.gmra.mxu0 %v4154_v20 }
 0x5c2   :  { %v2076_v3 = vadd.f32 %v4146_v44, %v2021_v37  ;;  %v2094_v34 = vmax.f32 %v2078_v36, 0.0  ;;  %v2042_v51 = vadd.f32 %v3192_v39, %v3160_v46  ;;  %v3165_v46 = vpop.f32.mrf.mxu1 }
 0x5c3   :  { %v2033_v41 = vpop.f32.mrf.mxu0 }
 0x5c4   :  { %v2092_v45 = vmax.f32 %v2076_v3, 0.0  ;;  %v2034_v54 = vadd.f32 %v2033_v41, %v1888_v58  ;;  %v2106_v61 = vpack.c.bf16 %v2094_v34, %v2093_v53  ;;  %v2081_v5 = vadd.f32 %v4146_v44, %v2042_v51  ;;  %v1907_v22 = vpop.f32.mrf.mxu1 }
 0x5c5   :  { %v3193_v55 = vpop.f32.mrf.mxu0 }
 0x5c6   :  { %v2045_v56 = vadd.f32 %v3193_v55, %v3161_v6  ;;  %v2105_v43 = vpack.c.bf16 %v2092_v45, %v2091_v42  ;;  %v2079_v63 = vadd.f32 %v4146_v44, %v2034_v54  ;;  %v2097_v16 = vmax.f32 %v2081_v5, 0.0 }
 0x5c7   :  { %v2036_v60 = vpop.f32.mrf.mxu0 }
 0x5c8   :  { %v2082_v1 = vadd.f32 %v4146_v44, %v2045_v56  ;;  %v2037_v4 = vadd.f32 %v2036_v60, %v1891_v19  ;;  %3250 = vmatprep.mubr.bf16.mxu0 %v2105_v43  ;;  %v2095_v48 = vmax.f32 %v2079_v63, 0.0 }
 0x5c9   :  { %v3196_v8 = vpop.f32.mrf.mxu0  ;;  %3251 = vmatmul.mubr.bf16.gmra.mxu0 %v2106_v61 }
 0x5ca   :  { %v2080_v58 = vadd.f32 %v4146_v44, %v2037_v4  ;;  %v2058_v25 = vadd.f32 %v3196_v8, %v3164_v40  ;;  %v2098_v9 = vmax.f32 %v2082_v1, 0.0 }
 0x5cb   :  { %v2049_v6 = vpop.f32.mrf.mxu0 }
 0x5cc   :  { %v2096_v52 = vmax.f32 %v2080_v58, 0.0  ;;  %v2050_v13 = vadd.f32 %v2049_v6, %v1904_v59  ;;  %v2085_v17 = vadd.f32 %v4146_v44, %v2058_v25  ;;  %v2108_v37 = vpack.c.bf16 %v2098_v9, %v2097_v16 }
 0x5cd   :  { %v3197_v0 = vpop.f32.mrf.mxu0 }
 0x5ce   :  { %v2061_v21 = vadd.f32 %v3197_v0, %v3165_v46  ;;  %v2107_v19 = vpack.c.bf16 %v2096_v52, %v2095_v48  ;;  %v2083_v14 = vadd.f32 %v4146_v44, %v2050_v13  ;;  %v2101_v40 = vmax.f32 %v2085_v17, 0.0 }
 0x5cf   :  { %v2052_v36 = vpop.f32.mrf.mxu0 }
 0x5d0   :  { %v2086_v39 = vadd.f32 %v4146_v44, %v2061_v21  ;;  %v2053_v3 = vadd.f32 %v2052_v36, %v1907_v22  ;;  %3254 = vmatprep.mubr.bf16.mxu0 %v2107_v19  ;;  %v2099_v42 = vmax.f32 %v2083_v14, 0.0 }
 0x5d1   :  { %3255 = vmatmul.mubr.bf16.gmra.mxu0 %v2108_v37 }
 0x5d2   :  { %v2102_v34 = vmax.f32 %v2086_v39, 0.0  ;;  %v2084_v41 = vadd.f32 %v4146_v44, %v2053_v3  ;;  %v3398_v44 = vld [vmem:[#allocation16 + $0x38] sm:$0xff]  }
 0x5d4   :  { %v2100_v45 = vmax.f32 %v2084_v41, 0.0  ;;  %v2110_v54 = vpack.c.bf16 %v2102_v34, %v2101_v40 }
 0x5d6   :  { %3198 = vmatprep.subr.bf16.mxu1 %v2110_v54  ;;  %v2109_v53 = vpack.c.bf16 %v2100_v45, %v2099_v42 }
 0x5d7   :  { %3199 = vmatpush3.bf16.msra.mxu1 %v2110_v54 }
 0x5d8   :  { %3200 = vmatprep.subr.bf16.mxu1 %v2109_v53  ;;  %3258 = vmatprep.mubr.bf16.mxu0 %v2109_v53 }
 0x5d9   :  { %3259 = vmatmul.mubr.bf16.gmra.mxu0 %v2110_v54 }
 0x5db   :  { %3201 = vmatpush3.bf16.msra.mxu1 %v2109_v53 }
 0x5dc   :  { %3202 = vmatprep.subr.bf16.mxu1 %v2108_v37 }
 0x5df   :  { %3203 = vmatpush3.bf16.msra.mxu1 %v2108_v37 }
 0x5e0   :  { %3204 = vmatprep.subr.bf16.mxu1 %v2107_v19 }
 0x5e3   :  { %3205 = vmatpush3.bf16.msra.mxu1 %v2107_v19 }
 0x5e4   :  { %3206 = vmatprep.subr.bf16.mxu1 %v2106_v61 }
 0x5e7   :  { %3207 = vmatpush3.bf16.msra.mxu1 %v2106_v61 }
 0x5e8   :  { %3208 = vmatprep.subr.bf16.mxu1 %v2105_v43 }
 0x5eb   :  { %3209 = vmatpush3.bf16.msra.mxu1 %v2105_v43 }
 0x5ec   :  { %3210 = vmatprep.subr.bf16.mxu1 %v4154_v20 }
 0x5ef   :  { %3211 = vmatpush3.bf16.msra.mxu1 %v4154_v20  ;;  %v3399_v20 = vld [vmem:[#allocation16 + $0x30] sm:$0xff]  }
 0x5f0   :  { %3212 = vmatprep.subr.bf16.mxu1 %v4152_v18 }
 0x5f3   :  { %3213 = vmatpush3.bf16.msra.mxu1 %v4152_v18  ;;  %v3400_v18 = vld [vmem:[#allocation16 + $0x28] sm:$0xff]  }
 0x5f4   :  { %3262 = vmatprep.subr.bf16.mxu1 %v3398_v44 }
 0x5f6   :  { %3215 = vmatmul.mubr.bf16.vlgmr.msra.gmra.mxu1 %v4050_v50  ;;  %v3401_v50 = vld [vmem:[#allocation16 + $0x20] sm:$0xff]  }
 0x5f7   :  { %3218 = vmatprep.mubr.bf16.mxu1 %v4053_v23  ;;  %3263 = vmatpush3.bf16.msra.mxu1 %v3398_v44  ;;  %v3402_v23 = vld [vmem:[#allocation16 + $0x18] sm:$0xff]  }
 0x5f8   :  { %3264 = vmatprep.subr.bf16.mxu1 %v3399_v20 }
 0x5fb   :  { %3265 = vmatpush3.bf16.msra.mxu1 %v3399_v20 }
 0x5fc   :  { %3266 = vmatprep.subr.bf16.mxu1 %v3400_v18 }
 0x5fe   :  { %3219 = vmatmul.mubr.bf16.gmra.mxu1 %v4057_v24  ;;  %v3403_v24 = vld [vmem:[#allocation16 + $0x10] sm:$0xff]  }
 0x5ff   :  { %3222 = vmatprep.mubr.bf16.mxu1 %v4059_v31  ;;  %3267 = vmatpush3.bf16.msra.mxu1 %v3400_v18  ;;  %v3404_v31 = vld [vmem:[#allocation16 + $0x8] sm:$0xff]  }
 0x600   :  { %3268 = vmatprep.subr.bf16.mxu1 %v3401_v50 }
 0x603   :  { %3269 = vmatpush3.bf16.msra.mxu1 %v3401_v50 }
 0x604   :  { %3270 = vmatprep.subr.bf16.mxu1 %v3402_v23 }
 0x606   :  { %3223 = vmatmul.mubr.bf16.gmra.mxu1 %v4063_v11  ;;  %v3405_v11 = vld [vmem:[#allocation16] sm:$0xff]  }
 0x607   :  { %3226 = vmatprep.mubr.bf16.mxu1 %v4065_v33  ;;  %3271 = vmatpush3.bf16.msra.mxu1 %v3402_v23 }
 0x608   :  { %3272 = vmatprep.subr.bf16.mxu1 %v3403_v24 }
 0x60b   :  { %3273 = vmatpush3.bf16.msra.mxu1 %v3403_v24 }
 0x60c   :  { %3274 = vmatprep.subr.bf16.mxu1 %v3404_v31 }
 0x60e   :  { %3227 = vmatmul.mubr.bf16.gmra.mxu1 %v4069_v10 }
 0x60f   :  { %3275 = vmatpush3.bf16.msra.mxu1 %v3404_v31 }
 0x610   :  { %3276 = vmatprep.subr.bf16.mxu1 %v3405_v11 }
 0x613   :  { %3277 = vmatpush3.bf16.msra.mxu1 %v3405_v11 }
 0x6b6   :  { %v3216_v33 = vpop.f32.mrf.mxu1 }
 0x6b7   :  { %v2210_v60 = vmul.f32 %v3216_v33, %v3968_v26 }
 0x6b8   :  { %v2145_v10 = vpop.f32.mrf.mxu1 }
 0x6b9   :  { %v2208_v43 = vmul.f32 %v2145_v10, %v3970_v27 }
 0x6ba   :  { %v3217_v51 = vpop.f32.mrf.mxu1 }
 0x6bb   :  { %v2211_v55 = vmul.f32 %v3217_v51, %v3972_v28 }
 0x6bc   :  { %v2148_v56 = vpop.f32.mrf.mxu1 }
 0x6bd   :  { %v2209_v59 = vmul.f32 %v2148_v56, %v3974_v29  ;;  %v2225_v1 = vpack.c.bf16 %v2211_v55, %v2210_v60 }
 0x6be   :  { %v3220_v61 = vpop.f32.mrf.mxu1 }
 0x6bf   :  { %v2224_v63 = vpack.c.bf16 %v2209_v59, %v2208_v43  ;;  %v2214_v27 = vmul.f32 %v3220_v61, %v3983_v38 }
 0x6c0   :  { %v2161_v4 = vpop.f32.mrf.mxu1 }
 0x6c1   :  { %3278 = vmatprep.mubr.bf16.mxu1 %v2224_v63  ;;  %v2212_v25 = vmul.f32 %v2161_v4, %v3978_v32 }
 0x6c2   :  { %v3221_v5 = vpop.f32.mrf.mxu1  ;;  %3279 = vmatmul.mubr.bf16.vlgmr.msra.gmra.mxu1 %v2225_v1 }
 0x6c3   :  { %v2215_v8 = vmul.f32 %v3221_v5, %v3980_v35 }
 0x6c4   :  { %v2164_v58 = vpop.f32.mrf.mxu1 }
 0x6c5   :  { %v2213_v28 = vmul.f32 %v2164_v58, %v3976_v30  ;;  %v2227_v9 = vpack.c.bf16 %v2215_v8, %v2214_v27 }
 0x6c6   :  { %v3224_v46 = vpop.f32.mrf.mxu1 }
 0x6c7   :  { %v2226_v29 = vpack.c.bf16 %v2213_v28, %v2212_v25  ;;  %v2218_v32 = vmul.f32 %v3224_v46, %v3998_v62  ;;  %v3248_v62 = vpop.f32.mrf.mxu0 }
 0x6c8   :  { %v2177_v26 = vpop.f32.mrf.mxu1 }
 0x6c9   :  { %3282 = vmatprep.mubr.bf16.mxu1 %v2226_v29  ;;  %v2216_v13 = vmul.f32 %v2177_v26, %v3990_v49  ;;  %v2346_v37 = vpop.f32.mrf.mxu0 }
 0x6ca   :  { %v3225_v6 = vpop.f32.mrf.mxu1  ;;  %3283 = vmatmul.mubr.bf16.gmra.mxu1 %v2227_v9 }
 0x6cb   :  { %v2219_v48 = vmul.f32 %v3225_v6, %v3996_v57  ;;  %v3249_v14 = vpop.f32.mrf.mxu0 }
 0x6cc   :  { %v2180_v52 = vpop.f32.mrf.mxu1 }
 0x6cd   :  { %v2217_v35 = vmul.f32 %v2180_v52, %v3988_v47  ;;  %v2229_v0 = vpack.c.bf16 %v2219_v48, %v2218_v32  ;;  %v2349_v39 = vpop.f32.mrf.mxu0 }
 0x6ce   :  { %v3228_v16 = vpop.f32.mrf.mxu1 }
 0x6cf   :  { %v2228_v30 = vpack.c.bf16 %v2217_v35, %v2216_v13  ;;  %v2222_v49 = vmul.f32 %v3228_v16, %v4011_v15  ;;  %v3252_v3 = vpop.f32.mrf.mxu0 }
 0x6d0   :  { %v2193_v38 = vpop.f32.mrf.mxu1 }
 0x6d1   :  { %3286 = vmatprep.mubr.bf16.mxu1 %v2228_v30  ;;  %v2220_v22 = vmul.f32 %v2193_v38, %v4006_v7  ;;  %v2362_v40 = vpop.f32.mrf.mxu0  ;;  %v4200_v7 = vld [vmem:[%s4235_s14] ss:$0 sm:$0xff]  ;;  %s3609_s14 = smov [#allocation19]  }
 0x6d2   :  { %v3229_v17 = vpop.f32.mrf.mxu1  ;;  %3287 = vmatmul.mubr.bf16.gmra.mxu1 %v2229_v0  ;;  %s2598_s28 = sshll.u32 %s3609_s14, 4  ;;  %s2599_s28 = int_to_ptr.vmem [resolvable:$true] %s2598_s28 }
 0x6d3   :  { %v2223_v21 = vmul.f32 %v3229_v17, %v4008_v12  ;;  %v3253_v34 = vpop.f32.mrf.mxu0  ;;  %s3566_s13 = scalar_lea.vmem %s2599_s28, 2048  ;;  %p3571_p13 = scmp.lt.s32.totalorder %s2599_s28, %s2599_s28 }
 0x6d4   :  { %v2196_v19 = vpop.f32.mrf.mxu1  ;;  %p3567_p12 = scmp.ne.s32.totalorder %s2599_s28, %s3566_s13  ;;  %p3572_p0 = scmp.lt.s32.totalorder %s3566_s13, %s3566_s13 }
 0x6d5   :  { %v2221_v57 = vmul.f32 %v2196_v19, %v4001_v2  ;;  %v2231_v47 = vpack.c.bf16 %v2223_v21, %v2222_v49  ;;  %v2365_v41 = vpop.f32.mrf.mxu0 }
 0x6d6   :  { %p3573_p1 = por %p3572_p0, %p3571_p13 }
 0x6d7   :  { %v2230_v36 = vpack.c.bf16 %v2221_v57, %v2220_v22  ;;  %v3256_v15 = vpop.f32.mrf.mxu0 }
 0x6d8   :  { %p3574_p2 = pnand %p3573_p1, %p3567_p12 }
 0x6d9   :  { %3290 = vmatprep.mubr.bf16.mxu1 %v2230_v36  ;;  %v2378_v18 = vpop.f32.mrf.mxu0 }
 0x6da   :  { %3291 = vmatmul.mubr.bf16.gmra.mxu1 %v2231_v47 }
 0x6db   :  { %v3257_v10 = vpop.f32.mrf.mxu0 }
 0x6dd   :  { %v2381_v61 = vpop.f32.mrf.mxu0 }
 0x6df   :  { %v3260_v25 = vpop.f32.mrf.mxu0 }
 0x6e1   :  { %v2394_v6 = vpop.f32.mrf.mxu0 }
 0x6e3   :  { %v3261_v30 = vpop.f32.mrf.mxu0 }
 0x6e5   :  { %v2397_v57 = vpop.f32.mrf.mxu0 }
 0x782   :  { %v3280_v12 = vpop.f32.mrf.mxu1 }
 0x783   :  { %v2500_v2 = vadd.f32 %v3280_v12, %v3248_v62 }
 0x784   :  { %v2491_v42 = vpop.f32.mrf.mxu1 }
 0x785   :  { %v2563_v45 = vadd.f32 %v4200_v7, %v2500_v2  ;;  %v2492_v54 = vadd.f32 %v2491_v42, %v2346_v37 }
 0x786   :  { %v3281_v53 = vpop.f32.mrf.mxu1 }
 0x787   :  { %2579 = vst [vmem:[#allocation19 + $0x10] sm:$0xff] %v2563_v45  ;;  %v2561_v44 = vadd.f32 %v4200_v7, %v2492_v54  ;;  %v2503_v20 = vadd.f32 %v3281_v53, %v3249_v14 }
 0x788   :  { %v2494_v50 = vpop.f32.mrf.mxu1 }
 0x789   :  { %2577 = vst [vmem:[#allocation19] sm:$0xff] %v2561_v44  ;;  %v2564_v23 = vadd.f32 %v4200_v7, %v2503_v20  ;;  %v2495_v24 = vadd.f32 %v2494_v50, %v2349_v39 }
 0x78a   :  { %v3284_v31 = vpop.f32.mrf.mxu1 }
 0x78b   :  { %2580 = vst [vmem:[#allocation19 + $0x18] sm:$0xff] %v2564_v23  ;;  %v2562_v11 = vadd.f32 %v4200_v7, %v2495_v24  ;;  %v2516_v33 = vadd.f32 %v3284_v31, %v3252_v3 }
 0x78c   :  { %v2507_v51 = vpop.f32.mrf.mxu1 }
 0x78d   :  { %2578 = vst [vmem:[#allocation19 + $0x8] sm:$0xff] %v2562_v11  ;;  %v2567_v55 = vadd.f32 %v4200_v7, %v2516_v33  ;;  %v2508_v56 = vadd.f32 %v2507_v51, %v2362_v40 }
 0x78e   :  { %v3285_v43 = vpop.f32.mrf.mxu1 }
 0x78f   :  { %2583 = vst [vmem:[#allocation19 + $0x30] sm:$0xff] %v2567_v55  ;;  %v2565_v59 = vadd.f32 %v4200_v7, %v2508_v56  ;;  %v2519_v60 = vadd.f32 %v3285_v43, %v3253_v34 }
 0x790   :  { %v2510_v63 = vpop.f32.mrf.mxu1 }
 0x791   :  { %2581 = vst [vmem:[#allocation19 + $0x20] sm:$0xff] %v2565_v59  ;;  %v2568_v1 = vadd.f32 %v4200_v7, %v2519_v60  ;;  %v2511_v4 = vadd.f32 %v2510_v63, %v2365_v41 }
 0x792   :  { %v3288_v5 = vpop.f32.mrf.mxu1 }
 0x793   :  { %2584 = vst [vmem:[#allocation19 + $0x38] sm:$0xff] %v2568_v1  ;;  %v2566_v8 = vadd.f32 %v4200_v7, %v2511_v4  ;;  %v2532_v58 = vadd.f32 %v3288_v5, %v3256_v15 }
 0x794   :  { %v2523_v28 = vpop.f32.mrf.mxu1 }
 0x795   :  { %2582 = vst [vmem:[#allocation19 + $0x28] sm:$0xff] %v2566_v8  ;;  %v2571_v27 = vadd.f32 %v4200_v7, %v2532_v58  ;;  %v2524_v46 = vadd.f32 %v2523_v28, %v2378_v18 }
 0x796   :  { %v3289_v29 = vpop.f32.mrf.mxu1 }
 0x797   :  { %2587 = vst [vmem:[#allocation19 + $0x50] sm:$0xff] %v2571_v27  ;;  %v2569_v9 = vadd.f32 %v4200_v7, %v2524_v46  ;;  %v2535_v26 = vadd.f32 %v3289_v29, %v3257_v10 }
 0x798   :  { %v2526_v48 = vpop.f32.mrf.mxu1 }
 0x799   :  { %2585 = vst [vmem:[#allocation19 + $0x40] sm:$0xff] %v2569_v9  ;;  %v2572_v52 = vadd.f32 %v4200_v7, %v2535_v26  ;;  %v2527_v13 = vadd.f32 %v2526_v48, %v2381_v61 }
 0x79a   :  { %v3292_v35 = vpop.f32.mrf.mxu1 }
 0x79b   :  { %2588 = vst [vmem:[#allocation19 + $0x58] sm:$0xff] %v2572_v52  ;;  %v2570_v32 = vadd.f32 %v4200_v7, %v2527_v13  ;;  %v2548_v16 = vadd.f32 %v3292_v35, %v3260_v25 }
 0x79c   :  { %v2539_v0 = vpop.f32.mrf.mxu1 }
 0x79d   :  { %2586 = vst [vmem:[#allocation19 + $0x48] sm:$0xff] %v2570_v32  ;;  %v2575_v38 = vadd.f32 %v4200_v7, %v2548_v16  ;;  %v2540_v17 = vadd.f32 %v2539_v0, %v2394_v6 }
 0x79e   :  { %v3293_v21 = vpop.f32.mrf.mxu1 }
 0x79f   :  { %2591 = vst [vmem:[#allocation19 + $0x70] sm:$0xff] %v2575_v38  ;;  %v2573_v19 = vadd.f32 %v4200_v7, %v2540_v17  ;;  %v2551_v22 = vadd.f32 %v3293_v21, %v3261_v30 }
 0x7a0   :  { %v2542_v49 = vpop.f32.mrf.mxu1 }
 0x7a1   :  { %2589 = vst [vmem:[#allocation19 + $0x60] sm:$0xff] %v2573_v19  ;;  %v2576_v36 = vadd.f32 %v4200_v7, %v2551_v22  ;;  %v2543_v47 = vadd.f32 %v2542_v49, %v2397_v57 }
 0x7a3   :  { %2592 = vst [vmem:[#allocation19 + $0x78] sm:$0xff] %v2576_v36  ;;  %v2574_v62 = vadd.f32 %v4200_v7, %v2543_v47 }
 0x7a5   :  { %2590 = vst [vmem:[#allocation19 + $0x68] sm:$0xff] %v2574_v62 }
 0x7a6   :  { %3577 = shalt.err (!%p3574_p2)
}
 0x7a7   :  { %s3610_s23 = smov 128   ;;  %s3611_s24 = smov 8  }
 0x7a8   :  { %2604 = dma.vmem_to_hbm [thread:$0]  %s2599_s28, 2048, %s4236_s15, [#allocation7], %s3610_s23, %s3610_s23, %s3611_s24  }
 0x7a9   :  { %3596 = dma.done.wait [#allocation7], 2048  }
 0x7aa   :  { %3597 = vsyncadd [#allocation7], 4294965248 }
 0x7ab   :  { %2608 = vsyncpa [#allocation6], 1 }
 0x7ac   :  { %2609 = vsyncpa [#allocation9], 1 }
 0x7ad   :  { %2610 = vsyncpa [#allocation12], 1 }
 0x7ae   :  { %2611 = vsyncpa [#allocation15], 1 }
 0x7af   :  { %2612 = vsyncpa [#allocation18], 1 }
 0x7b0   :  { %2613 = vsyncpa [#allocation7], 1 }

</bundles_post_ra>
